<compile_context>
chip_gen: v7x
topology: tpu7x:2x2x1
jax: 0.10.0
libtpu: 0.0.40
codegen_flags: <defaults>
</compile_context>

<pallas_src>
import jax
import jax.numpy as jnp
from jax.experimental import pallas as pl
from jax.experimental.pallas import tpu as pltpu

NEG_SLOPE = 0.2

EDGE_TYPES = [
    ("news", "on", "topic"),
    ("topic", "in", "news"),
    ("news", "has", "entities"),
    ("entities", "in", "news"),
    ("entities", "similar", "entities"),
    ("kg_entities", "in", "news"),
    ("news", "has", "kg_entities"),
]
NODE_TYPES = ["news", "topic", "entities", "kg_entities"]
TYPE_ID = {nt: i for i, nt in enumerate(NODE_TYPES)}
NUM_REL = len(EDGE_TYPES)
NUM_TYPES = len(NODE_TYPES)
NEWS_ID = TYPE_ID["news"]

P = 128        # lane-padded feature / hidden width
OUT_PAD = 128  # lane-padded output width of the final Linear

SRC_IDS = jnp.array([TYPE_ID[et[0]] for et in EDGE_TYPES], jnp.int32)
DST_IDS = jnp.array([TYPE_ID[et[2]] for et in EDGE_TYPES], jnp.int32)


# ---------------------------------------------------------------------------
# Fully fused forward kernel: grid = (num_layers, num_relations)
# ---------------------------------------------------------------------------
def fused_gnn_kernel(src_ids_ref, dst_ids_ref,                 # scalar prefetch (SMEM)
                     x_ref, adj_ref, wl_ref, wr_ref, vec_ref,
                     lin_w_ref, lin_b_ref,
                     logits_ref,
                     h_ref, acc_ref):
    layer = pl.program_id(0)
    rel = pl.program_id(1)
    n_layers = pl.num_programs(0)
    n_rel = pl.num_programs(1)

    # Seed the resident node-feature scratch with the (VMEM-resident) input features.
    @pl.when((layer == 0) & (rel == 0))
    def _seed():
        h_ref[...] = x_ref[...]

    # Zero the HeteroConv 'sum' accumulator at the start of every layer.
    @pl.when(rel == 0)
    def _zero():
        acc_ref[...] = jnp.zeros_like(acc_ref)

    s_id = src_ids_ref[rel]
    d_id = dst_ids_ref[rel]
    xs = h_ref[s_id]                                   # (n_pad, P) f32
    xd = h_ref[d_id]                                   # (n_pad, P) f32

    bl = vec_ref[0:1, :]                               # (1, P) f32
    br = vec_ref[1:2, :]
    att = vec_ref[2:3, :]
    bias = vec_ref[3:4, :]

    # lin_l / lin_r on the MXU (bf16 operands, f32 accumulate).
    l = jnp.dot(xs.astype(jnp.bfloat16), wl_ref[...],
                preferred_element_type=jnp.float32) + bl
    rt = jnp.dot(xd.astype(jnp.bfloat16), wr_ref[...],
                 preferred_element_type=jnp.float32) + br

    # GATv2 pairwise attention logits e[i, j] = att . leaky_relu(l[j] + r[i]).
    s = rt[:, None, :] + l[None, :, :]                 # (Nd, Ns, P) f32
    s = jnp.where(s > 0, s, NEG_SLOPE * s)             # LeakyReLU(0.2)
    e = jnp.sum(s * att[None, :, :], axis=-1)          # (Nd, Ns)

    # Masked softmax over incoming edges (cnt = edge multiplicity counts).
    cnt = adj_ref[...].astype(jnp.float32)             # (Nd, Ns)
    has_edge = cnt > 0.0
    e = jnp.where(has_edge, e, jnp.float32(-1e30))
    m = jnp.max(e, axis=-1, keepdims=True)
    p_w = jnp.exp(e - m) * cnt
    denom = jnp.sum(p_w, axis=-1, keepdims=True)
    alpha = p_w * pl.reciprocal(jnp.where(denom > 0.0, denom, 1.0), approx=True)

    # Weighted aggregation of transformed source features + output bias (MXU, bf16 operands).
    rel_out = jnp.dot(alpha.astype(jnp.bfloat16), l.astype(jnp.bfloat16),
                      preferred_element_type=jnp.float32) + bias

    # HeteroConv aggr='sum': accumulate into the destination node-type slab.
    acc_ref[d_id] = acc_ref[d_id] + rel_out

    # Layer boundary: ReLU, becomes next layer's input features (stays in VMEM).
    @pl.when(rel == n_rel - 1)
    def _layer_end():
        h_ref[...] = jnp.maximum(acc_ref[...], 0.0)

    # Final epilogue: Linear on the 'news' slab, single lane-dense writeback.
    @pl.when((rel == n_rel - 1) & (layer == n_layers - 1))
    def _final():
        logits_ref[...] = (
            jnp.dot(h_ref[NEWS_ID].astype(jnp.bfloat16), lin_w_ref[...],
                    preferred_element_type=jnp.float32) + lin_b_ref[...])


def kg_hetero_gnn(x_all, adj_all, params):
    """Whole forward pass (all HeteroConv layers + final Linear) in one pallas_call."""
    num_layers = params["wl"].shape[0]
    n_types, n_pad, p = x_all.shape
    out_pad = params["lin_w"].shape[1]

    grid_spec = pltpu.PrefetchScalarGridSpec(
        num_scalar_prefetch=2,                     # SRC_IDS, DST_IDS -> SMEM
        grid=(num_layers, NUM_REL),
        in_specs=[
            # x_all: fully VMEM-resident (constant index_map), read once.
            pl.BlockSpec((n_types, n_pad, p), lambda L, r, s, d: (0, 0, 0)),
            # per-relation adjacency multiplicity counts (bf16).
            pl.BlockSpec((None, n_pad, n_pad), lambda L, r, s, d: (r, 0, 0)),
            # per-(layer, relation) weight slabs (bf16).
            pl.BlockSpec((None, None, p, p), lambda L, r, s, d: (L, r, 0, 0)),   # Wl
            pl.BlockSpec((None, None, p, p), lambda L, r, s, d: (L, r, 0, 0)),   # Wr
            # packed per-(layer, relation) vectors: rows = [bl, br, att, bias, 0...].
            pl.BlockSpec((None, None, 8, p), lambda L, r, s, d: (L, r, 0, 0)),
            # final Linear (resident).
            pl.BlockSpec((p, out_pad), lambda L, r, s, d: (0, 0)),
            pl.BlockSpec((1, out_pad), lambda L, r, s, d: (0, 0)),
        ],
        out_specs=pl.BlockSpec((n_pad, out_pad), lambda L, r, s, d: (0, 0)),
        scratch_shapes=[
            pltpu.VMEM((n_types, n_pad, p), jnp.float32),   # h: current layer input features
            pltpu.VMEM((n_types, n_pad, p), jnp.float32),   # acc: HeteroConv sum accumulator
        ],
    )
    return pl.pallas_call(
        fused_gnn_kernel,
        grid_spec=grid_spec,
        out_shape=jax.ShapeDtypeStruct((n_pad, out_pad), jnp.float32),
        compiler_params=pltpu.CompilerParams(
            dimension_semantics=("arbitrary", "arbitrary")),
    )(SRC_IDS, DST_IDS, x_all, adj_all,
      params["wl"], params["wr"], params["vec"], params["lin_w"], params["lin_b"])


# ---------------------------------------------------------------------------
# Deterministic parameter / input construction (zero-padded, stacked per layer & relation)
# ---------------------------------------------------------------------------
def pad2(a, rows, cols):
    return jnp.pad(a, ((0, rows - a.shape[0]), (0, cols - a.shape[1])))


def glorot(key, shape):
    fan_in, fan_out = shape[0], shape[-1]
    limit = (6.0 / (fan_in + fan_out)) ** 0.5
    return jax.random.uniform(key, shape, jnp.float32, -limit, limit)


def make_params(key, in_dims, hidden_channels, out_channels, num_layers):
    wl_layers, wr_layers, vec_layers = [], [], []
    cur_in = dict(in_dims)
    hidden = hidden_channels
    for i in range(num_layers):
        wl_r, wr_r, vec_r = [], [], []
        for et in EDGE_TYPES:
            src, _, dst = et
            key, k1, k2, k3 = jax.random.split(key, 4)
            wl_r.append(pad2(glorot(k1, (cur_in[src], hidden)), P, P))
            wr_r.append(pad2(glorot(k2, (cur_in[dst], hidden)), P, P))
            att = pad2(glorot(k3, (1, hidden)), 1, P)
            # packed rows: 0=bl(0), 1=br(0), 2=att, 3=bias(0), 4..7 pad
            vec_r.append(jnp.concatenate(
                [jnp.zeros((2, P), jnp.float32), att, jnp.zeros((5, P), jnp.float32)],
                axis=0))
        wl_layers.append(jnp.stack(wl_r))
        wr_layers.append(jnp.stack(wr_r))
        vec_layers.append(jnp.stack(vec_r))
        cur_in = {nt: hidden for nt in NODE_TYPES}
        if i != num_layers - 1:
            hidden = int(hidden / 2)
    key, sub = jax.random.split(key)
    lin_w = pad2(glorot(sub, (hidden, out_channels)), P, OUT_PAD)
    return {
        "wl": jnp.stack(wl_layers).astype(jnp.bfloat16),     # (L, R, P, P)
        "wr": jnp.stack(wr_layers).astype(jnp.bfloat16),     # (L, R, P, P)
        "vec": jnp.stack(vec_layers),                        # (L, R, 8, P) f32
        "lin_w": lin_w.astype(jnp.bfloat16),                 # (P, OUT_PAD)
        "lin_b": jnp.zeros((1, OUT_PAD), jnp.float32),
    }


if __name__ == "__main__":
    key = jax.random.PRNGKey(0)

    num_nodes = {"news": 12, "topic": 8, "entities": 16, "kg_entities": 8}
    in_dims = {"news": 24, "topic": 16, "entities": 16, "kg_entities": 8}
    hidden_channels, out_channels, num_layers = 32, 4, 2
    num_edges = 24

    n_pad = max(8, ((max(num_nodes.values()) + 7) // 8) * 8)   # sublane-aligned node count

    # Node features, zero-padded and stacked: (NUM_TYPES, n_pad, P)
    feats = []
    for nt in NODE_TYPES:
        key, sub = jax.random.split(key)
        x = jax.random.normal(sub, (num_nodes[nt], in_dims[nt]), jnp.float32)
        feats.append(pad2(x, n_pad, P))
    x_all = jnp.stack(feats)

    # Random edges per relation, densified ONCE (hoisted out of the forward) as
    # edge-multiplicity counts (dst x src) so duplicate edges match PyG softmax semantics.
    adjs = []
    for et in EDGE_TYPES:
        src, _, dst = et
        key, k1, k2 = jax.random.split(key, 3)
        s = jax.random.randint(k1, (num_edges,), 0, num_nodes[src], jnp.int32)
        d = jax.random.randint(k2, (num_edges,), 0, num_nodes[dst], jnp.int32)
        adjs.append(jnp.zeros((n_pad, n_pad), jnp.float32).at[d, s].add(1.0))
    adj_all = jnp.stack(adjs).astype(jnp.bfloat16)   # counts are small ints -> exact in bf16

    key, sub = jax.random.split(key)
    params = make_params(sub, in_dims, hidden_channels, out_channels, num_layers)

    fwd = jax.jit(kg_hetero_gnn)
    logits_full = jax.block_until_ready(fwd(x_all, adj_all, params))
    out = logits_full[:num_nodes["news"], :out_channels]

    assert out.shape == (num_nodes["news"], out_channels)
    assert bool(jnp.all(jnp.isfinite(out)))
    print("KERNEL_OK")
</pallas_src>

<mosaic_0001>
module attributes {stable_mosaic.version = 11 : i64} {
  func.func @fused_gnn_kernel(%arg0: i32, %arg1: i32, %arg2: memref<7xi32, #tpu.memory_space<smem>>, %arg3: memref<7xi32, #tpu.memory_space<smem>>, %arg4: memref<4x16x128xf32, #tpu.memory_space<vmem>>, %arg5: memref<1x16x16xbf16, #tpu.memory_space<vmem>>, %arg6: memref<1x1x128x128xbf16, #tpu.memory_space<vmem>>, %arg7: memref<1x1x128x128xbf16, #tpu.memory_space<vmem>>, %arg8: memref<1x1x8x128xf32, #tpu.memory_space<vmem>>, %arg9: memref<128x128xbf16, #tpu.memory_space<vmem>>, %arg10: memref<1x128xf32, #tpu.memory_space<vmem>>, %arg11: memref<16x128xf32, #tpu.memory_space<vmem>>, %arg12: memref<4x16x128xf32, #tpu.memory_space<vmem>>, %arg13: memref<4x16x128xf32, #tpu.memory_space<vmem>>) attributes {dimension_semantics = [#tpu.dimension_semantics<arbitrary>, #tpu.dimension_semantics<arbitrary>], iteration_bounds = array<i64: 2, 7>, scalar_prefetch = 2 : i64, scratch_operands = 2 : i64, tpu.core_type = #tpu.core_type<tc>, window_params = [{pipeline_mode = #tpu.pipeline_mode<synchronous>, transform_indices = @transform_0, window_bounds = array<i64: 4, 16, 128>}, {transform_indices = @transform_1, window_bounds = array<i64: 1, 16, 16>}, {transform_indices = @transform_2, window_bounds = array<i64: 1, 1, 128, 128>}, {transform_indices = @transform_3, window_bounds = array<i64: 1, 1, 128, 128>}, {transform_indices = @transform_4, window_bounds = array<i64: 1, 1, 8, 128>}, {pipeline_mode = #tpu.pipeline_mode<synchronous>, transform_indices = @transform_5, window_bounds = array<i64: 128, 128>}, {pipeline_mode = #tpu.pipeline_mode<synchronous>, transform_indices = @transform_6, window_bounds = array<i64: 1, 128>}, {pipeline_mode = #tpu.pipeline_mode<synchronous>, transform_indices = @transform_7, window_bounds = array<i64: 16, 128>}]} {
    %c0_i32 = arith.constant 0 : i32
    %0 = arith.cmpi eq, %arg0, %c0_i32 : i32
    %c0_i32_0 = arith.constant 0 : i32
    %1 = arith.cmpi eq, %arg1, %c0_i32_0 : i32
    %2 = arith.andi %0, %1 : i1
    %3 = arith.extui %2 : i1 to i32
    %c0_i32_1 = arith.constant 0 : i32
    %4 = arith.cmpi ne, %3, %c0_i32_1 : i32
    scf.if %4 {
      %c0_49 = arith.constant 0 : index
      %c0_50 = arith.constant 0 : index
      %c0_51 = arith.constant 0 : index
      %95 = vector.load %arg4[%c0_49, %c0_50, %c0_51] : memref<4x16x128xf32, #tpu.memory_space<vmem>>, vector<4x16x128xf32>
      %c0_52 = arith.constant 0 : index
      %c0_53 = arith.constant 0 : index
      %c0_54 = arith.constant 0 : index
      %96 = vector.load %arg12[%c0_52, %c0_53, %c0_54] : memref<4x16x128xf32, #tpu.memory_space<vmem>>, vector<4x16x128xf32>
      tpu.vector_store %arg12[%c0_52, %c0_53, %c0_54], %95 {strides = array<i32>} : memref<4x16x128xf32, #tpu.memory_space<vmem>>, vector<4x16x128xf32>,
    } else {
    }
    %c0_i32_2 = arith.constant 0 : i32
    %5 = arith.cmpi eq, %arg1, %c0_i32_2 : i32
    %6 = arith.extui %5 : i1 to i32
    %c0_i32_3 = arith.constant 0 : i32
    %7 = arith.cmpi ne, %6, %c0_i32_3 : i32
    scf.if %7 {
      %cst_49 = arith.constant 0.000000e+00 : f32
      %95 = vector.broadcast %cst_49 : f32 to vector<4x16x128xf32>
      %c0_50 = arith.constant 0 : index
      %c0_51 = arith.constant 0 : index
      %c0_52 = arith.constant 0 : index
      %96 = vector.load %arg13[%c0_50, %c0_51, %c0_52] : memref<4x16x128xf32, #tpu.memory_space<vmem>>, vector<4x16x128xf32>
      tpu.vector_store %arg13[%c0_50, %c0_51, %c0_52], %95 {strides = array<i32>} : memref<4x16x128xf32, #tpu.memory_space<vmem>>, vector<4x16x128xf32>,
    } else {
    }
    %8 = arith.index_cast %arg1 : i32 to index
    %9 = memref.load %arg2[%8] : memref<7xi32, #tpu.memory_space<smem>>
    %10 = arith.index_cast %arg1 : i32 to index
    %11 = memref.load %arg3[%10] : memref<7xi32, #tpu.memory_space<smem>>
    %12 = arith.index_cast %9 : i32 to index
    %c0 = arith.constant 0 : index
    %c0_4 = arith.constant 0 : index
    %13 = vector.load %arg12[%12, %c0, %c0_4] : memref<4x16x128xf32, #tpu.memory_space<vmem>>, vector<1x16x128xf32>
    %14 = vector.shape_cast %13 : vector<1x16x128xf32> to vector<16x128xf32>
    %15 = arith.index_cast %11 : i32 to index
    %c0_5 = arith.constant 0 : index
    %c0_6 = arith.constant 0 : index
    %16 = vector.load %arg12[%15, %c0_5, %c0_6] : memref<4x16x128xf32, #tpu.memory_space<vmem>>, vector<1x16x128xf32>
    %17 = vector.shape_cast %16 : vector<1x16x128xf32> to vector<16x128xf32>
    %c0_7 = arith.constant 0 : index
    %c0_8 = arith.constant 0 : index
    %c0_9 = arith.constant 0 : index
    %c0_10 = arith.constant 0 : index
    %18 = vector.load %arg8[%c0_7, %c0_8, %c0_9, %c0_10] : memref<1x1x8x128xf32, #tpu.memory_space<vmem>>, vector<1x1x1x128xf32>
    %19 = vector.shape_cast %18 : vector<1x1x1x128xf32> to vector<1x128xf32>
    %c0_11 = arith.constant 0 : index
    %c0_12 = arith.constant 0 : index
    %c1 = arith.constant 1 : index
    %c0_13 = arith.constant 0 : index
    %20 = vector.load %arg8[%c0_11, %c0_12, %c1, %c0_13] : memref<1x1x8x128xf32, #tpu.memory_space<vmem>>, vector<1x1x1x128xf32>
    %21 = vector.shape_cast %20 : vector<1x1x1x128xf32> to vector<1x128xf32>
    %c0_14 = arith.constant 0 : index
    %c0_15 = arith.constant 0 : index
    %c2 = arith.constant 2 : index
    %c0_16 = arith.constant 0 : index
    %22 = vector.load %arg8[%c0_14, %c0_15, %c2, %c0_16] : memref<1x1x8x128xf32, #tpu.memory_space<vmem>>, vector<1x1x1x128xf32>
    %23 = vector.shape_cast %22 : vector<1x1x1x128xf32> to vector<1x128xf32>
    %c0_17 = arith.constant 0 : index
    %c0_18 = arith.constant 0 : index
    %c3 = arith.constant 3 : index
    %c0_19 = arith.constant 0 : index
    %24 = vector.load %arg8[%c0_17, %c0_18, %c3, %c0_19] : memref<1x1x8x128xf32, #tpu.memory_space<vmem>>, vector<1x1x1x128xf32>
    %25 = vector.shape_cast %24 : vector<1x1x1x128xf32> to vector<1x128xf32>
    %26 = arith.truncf %14 : vector<16x128xf32> to vector<16x128xbf16>
    %c0_20 = arith.constant 0 : index
    %c0_21 = arith.constant 0 : index
    %c0_22 = arith.constant 0 : index
    %c0_23 = arith.constant 0 : index
    %27 = vector.load %arg6[%c0_20, %c0_21, %c0_22, %c0_23] : memref<1x1x128x128xbf16, #tpu.memory_space<vmem>>, vector<1x1x128x128xbf16>
    %28 = vector.shape_cast %27 : vector<1x1x128x128xbf16> to vector<128x128xbf16>
    %cst = arith.constant dense<0.000000e+00> : vector<16x128xf32>
    %29 = tpu.matmul %26, %28, %cst {dimension_numbers = #tpu.dot_dimension_numbers<[1], [0], [0], [1], [0, 0, 1, 1], [], []>} : vector<16x128xbf16>, vector<128x128xbf16>, vector<16x128xf32> -> vector<16x128xf32>
    %30 = vector.broadcast %19 : vector<1x128xf32> to vector<16x128xf32>
    %31 = arith.addf %29, %30 : vector<16x128xf32>
    %32 = arith.truncf %17 : vector<16x128xf32> to vector<16x128xbf16>
    %c0_24 = arith.constant 0 : index
    %c0_25 = arith.constant 0 : index
    %c0_26 = arith.constant 0 : index
    %c0_27 = arith.constant 0 : index
    %33 = vector.load %arg7[%c0_24, %c0_25, %c0_26, %c0_27] : memref<1x1x128x128xbf16, #tpu.memory_space<vmem>>, vector<1x1x128x128xbf16>
    %34 = vector.shape_cast %33 : vector<1x1x128x128xbf16> to vector<128x128xbf16>
    %cst_28 = arith.constant dense<0.000000e+00> : vector<16x128xf32>
    %35 = tpu.matmul %32, %34, %cst_28 {dimension_numbers = #tpu.dot_dimension_numbers<[1], [0], [0], [1], [0, 0, 1, 1], [], []>} : vector<16x128xbf16>, vector<128x128xbf16>, vector<16x128xf32> -> vector<16x128xf32>
    %36 = vector.broadcast %21 : vector<1x128xf32> to vector<16x128xf32>
    %37 = arith.addf %35, %36 : vector<16x128xf32>
    %38 = vector.shape_cast %37 : vector<16x128xf32> to vector<16x1x128xf32>
    %39 = vector.shape_cast %31 : vector<16x128xf32> to vector<1x16x128xf32>
    %40 = vector.broadcast %38 : vector<16x1x128xf32> to vector<16x16x128xf32>
    %41 = vector.broadcast %39 : vector<1x16x128xf32> to vector<16x16x128xf32>
    %42 = arith.addf %40, %41 : vector<16x16x128xf32>
    %cst_29 = arith.constant 0.000000e+00 : f32
    %43 = vector.broadcast %cst_29 : f32 to vector<16x16x128xf32>
    %44 = arith.cmpf ogt, %42, %43 : vector<16x16x128xf32>
    %cst_30 = arith.constant 2.000000e-01 : f32
    %45 = vector.broadcast %cst_30 : f32 to vector<16x16x128xf32>
    %46 = arith.mulf %45, %42 : vector<16x16x128xf32>
    %47 = arith.select %44, %42, %46 : vector<16x16x128xi1>, vector<16x16x128xf32>
    %48 = vector.shape_cast %23 : vector<1x128xf32> to vector<1x1x128xf32>
    %49 = vector.broadcast %48 : vector<1x1x128xf32> to vector<16x16x128xf32>
    %50 = arith.mulf %47, %49 : vector<16x16x128xf32>
    %cst_31 = arith.constant dense<0.000000e+00> : vector<16x16xf32>
    %51 = vector.multi_reduction <add>, %50, %cst_31 [2] : vector<16x16x128xf32> to vector<16x16xf32>
    %c0_32 = arith.constant 0 : index
    %c0_33 = arith.constant 0 : index
    %c0_34 = arith.constant 0 : index
    %52 = vector.load %arg5[%c0_32, %c0_33, %c0_34] : memref<1x16x16xbf16, #tpu.memory_space<vmem>>, vector<1x16x16xbf16>
    %53 = vector.shape_cast %52 : vector<1x16x16xbf16> to vector<16x16xbf16>
    %54 = arith.extf %53 : vector<16x16xbf16> to vector<16x16xf32>
    %cst_35 = arith.constant 0.000000e+00 : f32
    %55 = vector.broadcast %cst_35 : f32 to vector<16x16xf32>
    %56 = arith.cmpf ogt, %54, %55 : vector<16x16xf32>
    %cst_36 = arith.constant -1.000000e+30 : f32
    %57 = vector.broadcast %cst_36 : f32 to vector<16x16xf32>
    %58 = arith.select %56, %51, %57 : vector<16x16xi1>, vector<16x16xf32>
    %cst_37 = arith.constant dense<0xFF800000> : vector<16xf32>
    %59 = vector.multi_reduction <maximumf>, %58, %cst_37 [1] : vector<16x16xf32> to vector<16xf32>
    %60 = vector.shape_cast %59 : vector<16xf32> to vector<16x1xf32>
    %61 = vector.broadcast %60 : vector<16x1xf32> to vector<16x16xf32>
    %62 = arith.subf %58, %61 : vector<16x16xf32>
    %63 = math.exp %62 : vector<16x16xf32>
    %64 = arith.mulf %63, %54 : vector<16x16xf32>
    %cst_38 = arith.constant dense<0.000000e+00> : vector<16xf32>
    %65 = vector.multi_reduction <add>, %64, %cst_38 [1] : vector<16x16xf32> to vector<16xf32>
    %66 = vector.shape_cast %65 : vector<16xf32> to vector<16x1xf32>
    %cst_39 = arith.constant 0.000000e+00 : f32
    %67 = vector.broadcast %cst_39 : f32 to vector<16x1xf32>
    %68 = arith.cmpf ogt, %66, %67 : vector<16x1xf32>
    %cst_40 = arith.constant 1.000000e+00 : f32
    %69 = vector.broadcast %cst_40 : f32 to vector<16x1xf32>
    %70 = arith.select %68, %66, %69 : vector<16x1xi1>, vector<16x1xf32>
    %71 = tpu.reciprocal %70 {approx = true} : vector<16x1xf32> -> vector<16x1xf32>
    %72 = vector.broadcast %71 : vector<16x1xf32> to vector<16x16xf32>
    %73 = arith.mulf %64, %72 : vector<16x16xf32>
    %74 = arith.truncf %73 : vector<16x16xf32> to vector<16x16xbf16>
    %75 = arith.truncf %31 : vector<16x128xf32> to vector<16x128xbf16>
    %cst_41 = arith.constant dense<0.000000e+00> : vector<16x128xf32>
    %76 = tpu.matmul %74, %75, %cst_41 {dimension_numbers = #tpu.dot_dimension_numbers<[1], [0], [0], [1], [0, 0, 1, 1], [], []>} : vector<16x16xbf16>, vector<16x128xbf16>, vector<16x128xf32> -> vector<16x128xf32>
    %77 = vector.broadcast %25 : vector<1x128xf32> to vector<16x128xf32>
    %78 = arith.addf %76, %77 : vector<16x128xf32>
    %79 = arith.index_cast %11 : i32 to index
    %c0_42 = arith.constant 0 : index
    %c0_43 = arith.constant 0 : index
    %80 = vector.load %arg13[%79, %c0_42, %c0_43] : memref<4x16x128xf32, #tpu.memory_space<vmem>>, vector<1x16x128xf32>
    %81 = vector.shape_cast %80 : vector<1x16x128xf32> to vector<16x128xf32>
    %82 = arith.addf %81, %78 : vector<16x128xf32>
    %83 = arith.index_cast %11 : i32 to index
    %c0_44 = arith.constant 0 : index
    %c0_45 = arith.constant 0 : index
    %84 = vector.load %arg13[%83, %c0_44, %c0_45] : memref<4x16x128xf32, #tpu.memory_space<vmem>>, vector<1x16x128xf32>
    %85 = vector.shape_cast %84 : vector<1x16x128xf32> to vector<16x128xf32>
    %86 = vector.shape_cast %82 : vector<16x128xf32> to vector<1x16x128xf32>
    tpu.vector_store %arg13[%83, %c0_44, %c0_45], %86 {strides = array<i32>} : memref<4x16x128xf32, #tpu.memory_space<vmem>>, vector<1x16x128xf32>,
    %c6_i32 = arith.constant 6 : i32
    %87 = arith.cmpi eq, %arg1, %c6_i32 : i32
    %88 = arith.extui %87 : i1 to i32
    %c0_i32_46 = arith.constant 0 : i32
    %89 = arith.cmpi ne, %88, %c0_i32_46 : i32
    scf.if %89 {
      %c0_49 = arith.constant 0 : index
      %c0_50 = arith.constant 0 : index
      %c0_51 = arith.constant 0 : index
      %95 = vector.load %arg13[%c0_49, %c0_50, %c0_51] : memref<4x16x128xf32, #tpu.memory_space<vmem>>, vector<4x16x128xf32>
      %cst_52 = arith.constant 0.000000e+00 : f32
      %96 = vector.broadcast %cst_52 : f32 to vector<4x16x128xf32>
      %97 = arith.maximumf %95, %96 : vector<4x16x128xf32>
      %c0_53 = arith.constant 0 : index
      %c0_54 = arith.constant 0 : index
      %c0_55 = arith.constant 0 : index
      %98 = vector.load %arg12[%c0_53, %c0_54, %c0_55] : memref<4x16x128xf32, #tpu.memory_space<vmem>>, vector<4x16x128xf32>
      tpu.vector_store %arg12[%c0_53, %c0_54, %c0_55], %97 {strides = array<i32>} : memref<4x16x128xf32, #tpu.memory_space<vmem>>, vector<4x16x128xf32>,
    } else {
    }
    %c6_i32_47 = arith.constant 6 : i32
    %90 = arith.cmpi eq, %arg1, %c6_i32_47 : i32
    %c1_i32 = arith.constant 1 : i32
    %91 = arith.cmpi eq, %arg0, %c1_i32 : i32
    %92 = arith.andi %90, %91 : i1
    %93 = arith.extui %92 : i1 to i32
    %c0_i32_48 = arith.constant 0 : i32
    %94 = arith.cmpi ne, %93, %c0_i32_48 : i32
    scf.if %94 {
      %c0_49 = arith.constant 0 : index
      %c0_50 = arith.constant 0 : index
      %c0_51 = arith.constant 0 : index
      %95 = vector.load %arg12[%c0_49, %c0_50, %c0_51] : memref<4x16x128xf32, #tpu.memory_space<vmem>>, vector<1x16x128xf32>
      %96 = vector.shape_cast %95 : vector<1x16x128xf32> to vector<16x128xf32>
      %97 = arith.truncf %96 : vector<16x128xf32> to vector<16x128xbf16>
      %c0_52 = arith.constant 0 : index
      %c0_53 = arith.constant 0 : index
      %98 = vector.load %arg9[%c0_52, %c0_53] : memref<128x128xbf16, #tpu.memory_space<vmem>>, vector<128x128xbf16>
      %cst_54 = arith.constant dense<0.000000e+00> : vector<16x128xf32>
      %99 = tpu.matmul %97, %98, %cst_54 {dimension_numbers = #tpu.dot_dimension_numbers<[1], [0], [0], [1], [0, 0, 1, 1], [], []>} : vector<16x128xbf16>, vector<128x128xbf16>, vector<16x128xf32> -> vector<16x128xf32>
      %c0_55 = arith.constant 0 : index
      %c0_56 = arith.constant 0 : index
      %100 = vector.load %arg10[%c0_55, %c0_56] : memref<1x128xf32, #tpu.memory_space<vmem>>, vector<1x128xf32>
      %101 = vector.broadcast %100 : vector<1x128xf32> to vector<16x128xf32>
      %102 = arith.addf %99, %101 : vector<16x128xf32>
      %c0_57 = arith.constant 0 : index
      %c0_58 = arith.constant 0 : index
      %103 = vector.load %arg11[%c0_57, %c0_58] : memref<16x128xf32, #tpu.memory_space<vmem>>, vector<16x128xf32>
      tpu.vector_store %arg11[%c0_57, %c0_58], %102 {strides = array<i32>} : memref<16x128xf32, #tpu.memory_space<vmem>>, vector<16x128xf32>,
    } else {
    }
    return
  }
  func.func @transform_0(%arg0: i32, %arg1: i32, %arg2: memref<7xi32, #tpu.memory_space<smem>>, %arg3: memref<7xi32, #tpu.memory_space<smem>>) -> (i32, i32, i32) {
    %c0_i32 = arith.constant 0 : i32
    %c0_i32_0 = arith.constant 0 : i32
    %c0_i32_1 = arith.constant 0 : i32
    %c0_i32_2 = arith.constant 0 : i32
    return %c0_i32, %c0_i32_0, %c0_i32_1 : i32, i32, i32
  }
  func.func @transform_1(%arg0: i32, %arg1: i32, %arg2: memref<7xi32, #tpu.memory_space<smem>>, %arg3: memref<7xi32, #tpu.memory_space<smem>>) -> (i32, i32, i32) {
    %c0_i32 = arith.constant 0 : i32
    %c0_i32_0 = arith.constant 0 : i32
    %c0_i32_1 = arith.constant 0 : i32
    return %arg1, %c0_i32, %c0_i32_0 : i32, i32, i32
  }
  func.func @transform_2(%arg0: i32, %arg1: i32, %arg2: memref<7xi32, #tpu.memory_space<smem>>, %arg3: memref<7xi32, #tpu.memory_space<smem>>) -> (i32, i32, i32, i32) {
    %c0_i32 = arith.constant 0 : i32
    %c0_i32_0 = arith.constant 0 : i32
    %c0_i32_1 = arith.constant 0 : i32
    return %arg0, %arg1, %c0_i32, %c0_i32_0 : i32, i32, i32, i32
  }
  func.func @transform_3(%arg0: i32, %arg1: i32, %arg2: memref<7xi32, #tpu.memory_space<smem>>, %arg3: memref<7xi32, #tpu.memory_space<smem>>) -> (i32, i32, i32, i32) {
    %c0_i32 = arith.constant 0 : i32
    %c0_i32_0 = arith.constant 0 : i32
    %c0_i32_1 = arith.constant 0 : i32
    return %arg0, %arg1, %c0_i32, %c0_i32_0 : i32, i32, i32, i32
  }
  func.func @transform_4(%arg0: i32, %arg1: i32, %arg2: memref<7xi32, #tpu.memory_space<smem>>, %arg3: memref<7xi32, #tpu.memory_space<smem>>) -> (i32, i32, i32, i32) {
    %c0_i32 = arith.constant 0 : i32
    %c0_i32_0 = arith.constant 0 : i32
    %c0_i32_1 = arith.constant 0 : i32
    return %arg0, %arg1, %c0_i32, %c0_i32_0 : i32, i32, i32, i32
  }
  func.func @transform_5(%arg0: i32, %arg1: i32, %arg2: memref<7xi32, #tpu.memory_space<smem>>, %arg3: memref<7xi32, #tpu.memory_space<smem>>) -> (i32, i32) {
    %c0_i32 = arith.constant 0 : i32
    %c0_i32_0 = arith.constant 0 : i32
    %c0_i32_1 = arith.constant 0 : i32
    return %c0_i32, %c0_i32_0 : i32, i32
  }
  func.func @transform_6(%arg0: i32, %arg1: i32, %arg2: memref<7xi32, #tpu.memory_space<smem>>, %arg3: memref<7xi32, #tpu.memory_space<smem>>) -> (i32, i32) {
    %c0_i32 = arith.constant 0 : i32
    %c0_i32_0 = arith.constant 0 : i32
    %c0_i32_1 = arith.constant 0 : i32
    return %c0_i32, %c0_i32_0 : i32, i32
  }
  func.func @transform_7(%arg0: i32, %arg1: i32, %arg2: memref<7xi32, #tpu.memory_space<smem>>, %arg3: memref<7xi32, #tpu.memory_space<smem>>) -> (i32, i32) {
    %c0_i32 = arith.constant 0 : i32
    %c0_i32_0 = arith.constant 0 : i32
    %c0_i32_1 = arith.constant 0 : i32
    return %c0_i32, %c0_i32_0 : i32, i32
  }
}

</mosaic_0001>

<bundles_post_ra>
// kernel: kg_hetero_gnn.1
= control target key start
LH: loop header
LB: loop body
LE: loop exit
PB: predicated region body
PF: predicated region fallthrough
CT: control target
= control target key end

     0   :  { %s3279_s0 = inlined_call_operand.vmem [shape: s32[7], index: 0, kind: input, shape index: {}]   ;;  %s3280_s2 = inlined_call_operand.hbm [shape: f32[4,16,128], index: 2, kind: input, shape index: {}]   ;;  %s3281_s3 = inlined_call_operand.hbm [shape: bf16[7,16,16], index: 3, kind: input, shape index: {}]   ;;  %s3282_s4 = inlined_call_operand.hbm [shape: bf16[2,7,128,128], index: 4, kind: input, shape index: {}]   ;;  %s3283_s5 = inlined_call_operand.hbm [shape: bf16[2,7,128,128], index: 5, kind: input, shape index: {}]   ;;  %s3284_s6 = inlined_call_operand.hbm [shape: f32[2,7,8,128], index: 6, kind: input, shape index: {}]   ;;  %s3285_s7 = inlined_call_operand.hbm [shape: bf16[128,128], index: 7, kind: input, shape index: {}]   ;;  %s3286_s8 = inlined_call_operand.vmem [shape: f32[1,128], index: 8, kind: input, shape index: {}]   ;;  %s3287_s9 = inlined_call_operand.hbm [shape: f32[16,128], index: 9, kind: output, shape index: {}]   ;;  %s3288_s1 = inlined_call_operand.vmem [shape: s32[7], index: 1, kind: input, shape index: {}]  }
   0x1   :  { %3318 = sst [smem:[#allocation39_spill]] %s3281_s3  ;;  %s14_s11 = sshll.u32 %s3279_s0, 4  ;;  %s15_s11 = int_to_ptr.vmem [resolvable:$true] %s14_s11 }
   0x2   :  { %3319 = sst [smem:[#allocation40_spill]] %s3283_s5  ;;  %s18_s14 = sshll.u32 %s3288_s1, 4  ;;  %s19_s14 = int_to_ptr.vmem [resolvable:$true] %s18_s14 }
   0x3   :  { %3320 = sst [smem:[#allocation41_spill]] %s3286_s8  ;;  %s2103_s15 = scalar_lea.vmem %s15_s11, 16 }
   0x4   :  { %3321 = sst [smem:[#allocation42_spill]] %s3287_s9  ;;  %p2104_p0 = scmp.ne.s32.totalorder %s15_s11, %s2103_s15 }
   0x5   :  { %p2108_p1 = scmp.lt.s32.totalorder %s15_s11, %s15_s11  ;;  %p2109_p2 = scmp.lt.s32.totalorder %s2103_s15, %s2103_s15 }
   0x7   :  { %p2110_p3 = por %p2109_p2, %p2108_p1 }
   0x9   :  { %p2111_p4 = pnand %p2110_p3, %p2104_p0 }
   0xb   :  { %2114 = shalt.err (!%p2111_p4)  }
   0xc   :  { %s2443_s16 = smov [#allocation5]   ;;  %s2115_s17 = scalar_lea.vmem %s19_s14, 16 }
   0xd   :  { %17 = dma.vmem_to_smem %s15_s11, 16, %s2443_s16, [#allocation4] }
   0xe   :  { %p2116_p5 = scmp.ne.s32.totalorder %s19_s14, %s2115_s17  ;;  %p2120_p6 = scmp.lt.s32.totalorder %s19_s14, %s19_s14 }
   0xf   :  { %p2121_p7 = scmp.lt.s32.totalorder %s2115_s17, %s2115_s17 }
  0x11   :  { %p2122_p8 = por %p2121_p7, %p2120_p6 }
  0x13   :  { %p2123_p9 = pnand %p2122_p8, %p2116_p5 }
  0x15   :  { %2126 = shalt.err (!%p2123_p9)  }
  0x16   :  { %s2444_s0 = smov [#allocation6]  }
  0x17   :  { %21 = dma.vmem_to_smem %s19_s14, 16, %s2444_s0, [#allocation4] }
  0x18   :  { %2373 = dma.done.wait [#allocation4], 32 }
  0x19   :  { %2374 = vsyncadd [#allocation4], 4294967264 }
  0x1a   :  { %23 = sfence }
  0x1b   :  { %24 = vsyncpa [#allocation8], 0 }
  0x1c   :  { %25 = vsyncpa [#allocation11], 0 }
  0x1d   :  { %27 = vsyncpa [#allocation11 + $0x1], 0 }
  0x1e   :  { %28 = vsyncpa [#allocation14], 0 }
  0x1f   :  { %30 = vsyncpa [#allocation14 + $0x1], 0 }
  0x20   :  { %31 = vsyncpa [#allocation17], 0 }
  0x21   :  { %32 = vsyncpa [#allocation9], 0  ;;  %s2520_s1 = smov 0   ;;  %s2522_s18 = smov 0  }
  0x22   :  { %s2524_s19 = smov 0   ;;  %s2526_s20 = smov 0  }
  0x23   :  { %s2528_s21 = smov 0   ;;  %s2530_s22 = smov 0  }
  0x24   :  { %s2532_s23 = smov 0   ;;  %s2534_s24 = smov 0  }
  0x25   :  { %s2536_s25 = smov 0   ;;  %s2538_s26 = smov 0  }
  0x26   :  { %s2540_s27 = smov 0  }
  0x27 LB: > { %3322 = sst [smem:[#allocation26_spill]] %s2405_s18  ;;  %s47_s28 = sadd.s32 1, %s2433_s25  ;;  %s2441_s27 = sphi %s2540_s27, %s38_s27   ;;  %s2437_s26 = sphi %s2538_s26, %s3387_s26   ;;  %s2433_s25 = sphi %s2536_s25, %s3386_s25   ;;  %s2429_s24 = sphi %s2534_s24, %s3385_s24   ;;  %s2425_s23 = sphi %s2532_s23, %s3384_s23   ;;  %s2421_s22 = sphi %s2530_s22, %s3381_s22   ;;  %s2417_s21 = sphi %s2528_s21, %s3380_s21   ;;  %s2413_s20 = sphi %s2526_s20, %s3379_s20   ;;  %s2409_s19 = sphi %s2524_s19, %s3378_s19   ;;  %s2405_s18 = sphi %s2522_s18, %s3377_s18   ;;  %s2401_s1 = sphi %s2520_s1, %s3376_s1  }
  0x28   : > { %3323 = sst [smem:[#allocation27_spill]] %s2409_s19  ;;  %s78_s29 = sadd.s32 1, %s2421_s22 }
  0x29   : > { %3324 = sst [smem:[#allocation28_spill]] %s2417_s21  ;;  %p2577_p10 = scmp.ge.s32.totalorder %s47_s28, 7 }
  0x2a   : > { %3325 = sst [smem:[#allocation29_spill]] %s2421_s22  ;;  %p85_p11 = scmp.ne.s32.totalorder %s2421_s22, %s2417_s21 }
  0x2b   : > { %3326 = sst [smem:[#allocation30_spill]] %s2425_s23  ;;  %p3293_p12 = scmp.eq.s32.totalorder %s2441_s27, 0 }
  0x2c   : > { %3327 = sst [smem:[#allocation31_spill]] %s2429_s24  ;;  %s3389_s28 = smov (%p2577_p10, %s47_s28), 0 }
  0x2d   : > { %3328 = sst [smem:[#allocation32_spill]] %s2441_s27  ;;  %p2590_p13 = por %p3293_p12, %p85_p11 }
  0x2e   : > { %3330 = sst [smem:[#allocation33_spill]] %s3389_s28  ;;  %s2596_s11 = ssub.s32 %s2433_s25, %s3389_s28 }
  0x2f   : > { %p76_p0 = scmp.eq.s32.totalorder %s2596_s11, 0  ;;  %p3292_p1 = scmp.lt.s32.totalorder %s2441_s27, 14 }
  0x30   : > { %s3291_s12 = sand.u32 1, %s2441_s27   ;;  %s293_s13 = sand.u32 1, %s2421_s22  }
  0x31   : > { %s2603_s14 = scalar_select %p76_p0, %s2421_s22, %s78_s29  }
  0x32   : > { %s1760_s15 = sshll.u32 %s293_s13, 3  ;;  %s1816_s16 = sshll.u32 %s2433_s25, 7 }
  0x33   : > { %3332 = sst [smem:[#allocation34_spill]] %s2603_s14  ;;  %s3333_s3 = sld [smem:[#allocation39_spill]] }
  0x34   : > { %s295_s28 = scalar_lea.vmem [#allocation10], %s1760_s15  ;;  %p2617_p2 = pnand %p3292_p1, %p2590_p13 }
  0x35   : > { %s302_s8 = sshll.u32 %s295_s28, 4  ;;  %s2623_s13 = scalar_lea.sflag [#allocation11], %s3291_s12  ;;  %s2611_s8 = int_to_ptr.vmem [resolvable:$true] %s302_s8 }
  0x36   : > { %p2129_p4 = pneg %p2617_p2 }
  0x39   : > { %s2609_s9 = scalar_lea.hbm %s3333_s3, %s1816_s16  ;;  %s2132_s15 = scalar_lea.hbm %s3333_s3, 896 }
  0x3a   : > { %s2127_s16 = scalar_lea.hbm %s2609_s9, 128  ;;  %p2133_p7 = scmp.lt.u32.totalorder %s2609_s9, %s3333_s3 }
  0x3b   : > { %p2128_p3 = scmp.ne.s32.totalorder %s2609_s9, %s2127_s16  ;;  %p2134_p8 = scmp.lt.u32.totalorder %s2132_s15, %s2127_s16 }
  0x3c   : > { %p2136_p11 = scmp.lt.u32.totalorder %s2127_s16, %s2609_s9 }
  0x3d   : > { %p2130_p5 = pnand %p2129_p4, %p2128_p3  ;;  %p2135_p9 = por %p2134_p8, %p2133_p7 }
  0x3f   : > { %p2131_p6 = pneg %p2130_p5  ;;  %p2137_p13 = por %p2136_p11, %p2135_p9 }
  0x41   : > { %p2138_p0 = pnand %p2137_p13, %p2131_p6 }
  0x43   : > { %2141 = shalt.err (!%p2138_p0)
}
  0x44   : > { %s2142_s12 = scalar_lea.vmem %s2611_s8, 128  ;;  %s2445_s28 = smov [#allocation10]  }
  0x45   : > { %p2143_p3 = scmp.ne.s32.totalorder %s2611_s8, %s2142_s12  ;;  %s2147_s10 = sshll.u32 %s2445_s28, 4  ;;  %s2148_s10 = int_to_ptr.vmem [resolvable:$false] %s2147_s10 }
  0x46   : > { %s2149_s17 = scalar_lea.vmem %s2148_s10, 256  ;;  %p2150_p12 = scmp.lt.s32.totalorder %s2611_s8, %s2148_s10 }
  0x47   : > { %p2145_p5 = pnand %p2143_p3, %p2129_p4  ;;  %p2151_p7 = scmp.lt.s32.totalorder %s2149_s17, %s2142_s12 }
  0x49   : > { %p2146_p1 = pneg %p2145_p5  ;;  %p2152_p8 = por %p2151_p7, %p2150_p12 }
  0x4b   : > { %p2153_p9 = pnand %p2152_p8, %p2146_p1 }
  0x4d   : > { %2156 = shalt.err (!%p2153_p9)
}
  0x4e   : > { %s3294_s16 = smov 64   ;;  %s3296_s12 = smov 4  }
  0x4f   : > { %1949 = dma.hbm_to_vmem [thread:$0]  (!%p2617_p2), %s2609_s9, 128, %s2611_s8, %s2623_s13, %s3294_s16, %s3294_s16, %s3296_s12  }
  0x50   : > { %s50_s15 = sadd.s32 1, %s2437_s26  ;;  %s106_s0 = sadd.s32 1, %s2409_s19 }
  0x51   : > { %s3391_s15 = smov (!%p2577_p10, %s50_s15), %s2437_s26  ;;  %p113_p12 = scmp.ne.s32.totalorder %s2409_s19, %s2405_s18 }
  0x52   : > { %p52_p1 = scmp.ge.s32.totalorder %s3391_s15, 2  ;;  %s3300_s28 = sand.u32 1, %s2409_s19  }
  0x53   : > { %p3335_p4 = scmp.eq.s32.totalorder %s2441_s27, 0  ;;  %s1763_s29 = sshll.u32 %s3300_s28, 6 }
  0x54   : > { %s3393_s15 = smov (%p52_p1, %s3391_s15), 0  ;;  %s1764_s8 = sshll.u32 %s2433_s25, 4 }
  0x55   : > { %p2664_p6 = por %p113_p12, %p3335_p4  ;;  %3337 = sst [smem:[#allocation35_spill]] %s3393_s15 }
  0x56   : > { %s101_s9 = ssub.s32 %s2437_s26, %s3393_s15  ;;  %s1916_s30 = smul.u32 112, %s2437_s26 }
  0x57   : > { %s103_s17 = sor.u32 %s101_s9, %s2596_s11  ;;  %s316_s16 = scalar_lea.vmem [#allocation12], %s1763_s29 }
  0x58   : > { %s325_s12 = sshll.u32 %s316_s16, 4  ;;  %p104_p10 = scmp.eq.s32.totalorder %s103_s17, 0  ;;  %s2677_s12 = int_to_ptr.vmem [resolvable:$true] %s325_s12 }
  0x59   : > { %s322_s3 = sadd.s32 %s1916_s30, %s1764_s8  ;;  %p3339_p2 = scmp.lt.s32.totalorder %s2441_s27, 14 }
  0x5a   : > { %s1765_s14 = sshll.u32 %s322_s3, 6  ;;  %s3341_s5 = sld [smem:[#allocation40_spill]] }
  0x5b   : > { %s2680_s22 = scalar_select %p104_p10, %s2409_s19, %s106_s0  }
  0x5c   : > { %s2685_s28 = scalar_lea.hbm %s3282_s4, %s1765_s14  ;;  %p2691_p11 = pnand %p3339_p2, %p2664_p6 }
  0x5d   : > { %3338 = sst [smem:[#allocation36_spill]] %s2680_s22  ;;  %s339_s0 = scalar_lea.vmem [#allocation13], %s1763_s29 }
  0x5e   : > { %s3340_s15 = scalar_select %p2691_p11, 1, 0 }
  0x5f   : > { %s348_s23 = sshll.u32 %s339_s0, 4  ;;  %s3342_s24 = sand.u32 1, %s2441_s27   ;;  %s2700_s23 = int_to_ptr.vmem [resolvable:$true] %s348_s23 }
  0x60   : > { %s2698_s3 = scalar_lea.hbm %s3341_s5, %s1765_s14  ;;  %s2704_s10 = scalar_lea.sflag [#allocation14], %s3342_s24 }
  0x61   : > { %s2157_s8 = scalar_lea.hbm %s2698_s3, 1024  ;;  %p2710_p0 = pneg %p2691_p11 }
  0x62   : > { %p2158_p13 = scmp.ne.s32.totalorder %s2698_s3, %s2157_s8  ;;  %s2162_s29 = scalar_lea.hbm %s3341_s5, 14336 }
  0x63   : > { %s3343_s9 = scalar_select %p2710_p0, 1, 0 }
  0x64   : > { %p2160_p3 = pnand %p2710_p0, %p2158_p13  ;;  %p2163_p7 = scmp.lt.u32.totalorder %s2698_s3, %s3341_s5 }
  0x65   : > { %p2164_p8 = scmp.lt.u32.totalorder %s2162_s29, %s2157_s8  ;;  %p2166_p12 = scmp.lt.u32.totalorder %s2157_s8, %s2698_s3 }
  0x66   : > { %p2161_p5 = pneg %p2160_p3 }
  0x67   : > { %p2165_p9 = por %p2164_p8, %p2163_p7 }
  0x69   : > { %p2167_p1 = por %p2166_p12, %p2165_p9 }
  0x6b   : > { %p2168_p4 = pnand %p2167_p1, %p2161_p5 }
  0x6d   : > { %2171 = shalt.err (!%p2168_p4)
}
  0x6e   : > { %s2172_s16 = scalar_lea.vmem %s2700_s23, 1024  ;;  %s2448_s0 = smov [#allocation13]  }
  0x6f   : > { %p2173_p6 = scmp.ne.s32.totalorder %s2700_s23, %s2172_s16  ;;  %s2177_s24 = sshll.u32 %s2448_s0, 4  ;;  %s2178_s24 = int_to_ptr.vmem [resolvable:$false] %s2177_s24 }
  0x70   : > { %s2179_s14 = scalar_lea.vmem %s2178_s24, 2048  ;;  %p2180_p13 = scmp.lt.s32.totalorder %s2700_s23, %s2178_s24 }
  0x71   : > { %p2175_p10 = pnand %p2173_p6, %p2710_p0  ;;  %p2181_p3 = scmp.lt.s32.totalorder %s2179_s14, %s2172_s16 }
  0x73   : > { %p2176_p2 = pneg %p2175_p10  ;;  %p2182_p7 = por %p2181_p3, %p2180_p13 }
  0x75   : > { %p2183_p8 = pnand %p2182_p7, %p2176_p2 }
  0x77   : > { %2186 = shalt.err (!%p2183_p8)
}
  0x78   : > { %s3344_s8 = smov 4   ;;  %s3345_s30 = smov 64  }
  0x79   : > { %1955 = dma.hbm_to_vmem [thread:$0]  (!%p2691_p11), %s2698_s3, 1024, %s2700_s23, %s2704_s10, %s3345_s30, %s3345_s30, %s3344_s8  }
  0x7a   : > { %s2738_s29 = sadd.s32 4294967295, %s2441_s27   ;;  %p91_p5 = scmp.ne.s32.totalorder %s2417_s21, %s2413_s20 }
  0x7b   : > { %p3306_p9 = scmp.eq.s32.totalorder %s2738_s29, 0  ;;  %p119_p12 = scmp.ne.s32.totalorder %s2405_s18, %s2401_s1 }
  0x7c   : > { %p1756_p1 = scmp.ge.s32.totalorder %s2441_s27, 1  ;;  %p249_p4 = scmp.lt.s32.totalorder %s2441_s27, 15 }
  0x7d   : > { %p2749_p6 = por %p3306_p9, %p91_p5  ;;  %p2755_p10 = por %p119_p12, %p3306_p9 }
  0x7e   : > { %p2759_p2 = pnand %p1756_p1, %p249_p4  ;;  %s2449_s1 = smov [#allocation7]  }
  0x7f   : > { %s3346_s17 = scalar_select %p2749_p6, 1, 0 }
  0x80   : > { %s3348_s3 = scalar_select %p2755_p10, 1, 0 }
  0x81   : > { %3347 = sst [smem:[#allocation37_spill]] %s3346_s17  ;;  %p1939_p13 = pneg %p2759_p2 }
  0x82   : > { %3349 = sst [smem:[#allocation38_spill]] %s3348_s3  ;;  %s261_s20 = sshll.u32 %s2449_s1, 4  ;;  %s262_s20 = int_to_ptr.vmem [resolvable:$true] %s261_s20 }
  0x83   : > { %s3350_s23 = scalar_select %p2759_p2, 1, 0 }
  0x84   : > { %p2767_p3 = pnand %p1939_p13, %p3306_p9  ;;  %s2450_s16 = smov [#allocation16]  }
  0x85   : > { %s274_s0 = sshll.u32 %s2450_s16, 4  ;;  %s3352_s24 = sand.u32 1, %s2409_s19   ;;  %s2775_s0 = int_to_ptr.vmem [resolvable:$true] %s274_s0 }
  0x86   : > { %s2773_s14 = sshll.u32 %s3352_s24, 3  ;;  %s2187_s27 = scalar_lea.hbm %s3280_s2, 1024 }
  0x87   : > { %p2188_p7 = scmp.ne.s32.totalorder %s3280_s2, %s2187_s27  ;;  %p2189_p8 = pneg %p2767_p3 }
  0x88   : > { %p2194_p1 = scmp.lt.u32.totalorder %s2187_s27, %s3280_s2 }
  0x89   : > { %p2190_p5 = pnand %p2189_p8, %p2188_p7 }
  0x8b   : > { %p2191_p12 = pneg %p2190_p5 }
  0x8d   : > { %p2196_p4 = pnand %p2194_p1, %p2191_p12 }
  0x8f   : > { %2199 = shalt.err (!%p2196_p4)
}
  0x90   : > { %s2200_s24 = scalar_lea.vmem %s262_s20, 1024  ;;  %p2208_p6 = scmp.lt.s32.totalorder %s262_s20, %s262_s20 }
  0x91   : > { %p2201_p13 = scmp.ne.s32.totalorder %s262_s20, %s2200_s24  ;;  %p2209_p2 = scmp.lt.s32.totalorder %s2200_s24, %s2200_s24 }
  0x93   : > { %p2203_p9 = pnand %p2201_p13, %p2189_p8  ;;  %p2210_p11 = por %p2209_p2, %p2208_p6 }
  0x95   : > { %p2204_p10 = pneg %p2203_p9 }
  0x97   : > { %p2211_p0 = pnand %p2210_p11, %p2204_p10 }
  0x99   : > { %2214 = shalt.err (!%p2211_p0)
}
  0x9a   : > { %s2451_s5 = smov 128   ;;  %s2452_s22 = smov 8  }
  0x9b   : > { %1942 = dma.hbm_to_vmem [thread:$0]  (!%p2767_p3), %s3280_s2, 1024, %s262_s20, [#allocation8], %s2451_s5, %s2451_s5, %s2452_s22  }
  0x9c   : > { %s2215_s16 = scalar_lea.hbm %s3285_s7, 1024 }
  0x9d   : > { %p2216_p9 = scmp.ne.s32.totalorder %s3285_s7, %s2215_s16  ;;  %p2222_p6 = scmp.lt.u32.totalorder %s2215_s16, %s3285_s7 }
  0x9f   : > { %p2218_p11 = pnand %p2216_p9, %p2189_p8 }
  0xa1   : > { %p2219_p0 = pneg %p2218_p11 }
  0xa3   : > { %p2224_p10 = pnand %p2222_p6, %p2219_p0 }
  0xa5   : > { %2227 = shalt.err (!%p2224_p10)
}
  0xa6   : > { %s2228_s20 = scalar_lea.vmem %s2775_s0, 1024  ;;  %p2236_p12 = scmp.lt.s32.totalorder %s2775_s0, %s2775_s0 }
  0xa7   : > { %p2229_p2 = scmp.ne.s32.totalorder %s2775_s0, %s2228_s20  ;;  %p2237_p1 = scmp.lt.s32.totalorder %s2228_s20, %s2228_s20 }
  0xa9   : > { %p2231_p7 = pnand %p2229_p2, %p2189_p8  ;;  %p2238_p4 = por %p2237_p1, %p2236_p12 }
  0xab   : > { %p2232_p5 = pneg %p2231_p7 }
  0xad   : > { %p2239_p13 = pnand %p2238_p4, %p2232_p5 }
  0xaf   : > { %2242 = shalt.err (!%p2239_p13)
}
  0xb0   : > { %1945 = dma.hbm_to_vmem [thread:$0]  (!%p2767_p3), %s3285_s7, 1024, %s2775_s0, [#allocation17], %s3345_s30, %s3345_s30, %s3344_s8  }
  0xb1   : > { %s2243_s17 = scalar_lea.hbm %s2685_s28, 1024  ;;  %p3353_p9 = scmp.ne.s32.totalorder %s3343_s9, 0 }
  0xb2   : > { %p2244_p8 = scmp.ne.s32.totalorder %s2685_s28, %s2243_s17  ;;  %s2248_s22 = scalar_lea.hbm %s3282_s4, 14336 }
  0xb3   : > { %p2249_p6 = scmp.lt.u32.totalorder %s2685_s28, %s3282_s4  ;;  %p2250_p10 = scmp.lt.u32.totalorder %s2248_s22, %s2243_s17 }
  0xb4   : > { %p2246_p11 = pnand %p2244_p8, %p3353_p9  ;;  %p2252_p7 = scmp.lt.u32.totalorder %s2243_s17, %s2685_s28 }
  0xb5   : > { %p2251_p2 = por %p2250_p10, %p2249_p6 }
  0xb6   : > { %p2247_p0 = pneg %p2246_p11 }
  0xb7   : > { %p2253_p5 = por %p2252_p7, %p2251_p2 }
  0xb9   : > { %p2254_p12 = pnand %p2253_p5, %p2247_p0 }
  0xbb   : > { %2257 = shalt.err (!%p2254_p12)
}
  0xbc   : > { %s2258_s0 = scalar_lea.vmem %s2677_s12, 1024  ;;  %s2453_s3 = smov [#allocation12]  }
  0xbd   : > { %p2259_p3 = scmp.ne.s32.totalorder %s2677_s12, %s2258_s0  ;;  %s2263_s1 = sshll.u32 %s2453_s3, 4  ;;  %s2264_s1 = int_to_ptr.vmem [resolvable:$false] %s2263_s1 }
  0xbe   : > { %s2265_s16 = scalar_lea.vmem %s2264_s1, 2048  ;;  %p2266_p13 = scmp.lt.s32.totalorder %s2677_s12, %s2264_s1 }
  0xbf   : > { %p2261_p1 = pnand %p2259_p3, %p3353_p9  ;;  %p2267_p8 = scmp.lt.s32.totalorder %s2265_s16, %s2258_s0 }
  0xc1   : > { %p2262_p4 = pneg %p2261_p1  ;;  %p2268_p11 = por %p2267_p8, %p2266_p13 }
  0xc3   : > { %p2269_p6 = pnand %p2268_p11, %p2262_p4 }
  0xc5   : > { %2272 = shalt.err (!%p2269_p6)
}
  0xc6   : > { %p3354_p0 = scmp.ne.s32.totalorder %s3340_s15, 0  ;;  %s1918_s24 = smul.u32 7, %s2437_s26 }
  0xc7   : > { %s362_s20 = scalar_lea.vmem [#allocation15], %s2773_s14 }
  0xc8   : > { %1952 = dma.hbm_to_vmem [thread:$0]  (!%p3354_p0), %s2685_s28, 1024, %s2677_s12, %s2623_s13, %s3345_s30, %s3345_s30, %s3344_s8  }
  0xc9   : > { %s371_s18 = sshll.u32 %s362_s20, 4  ;;  %s367_s21 = sadd.s32 %s2433_s25, %s1918_s24  ;;  %s2855_s18 = int_to_ptr.vmem [resolvable:$true] %s371_s18 }
  0xca   : > { %s1770_s17 = sshll.u32 %s367_s21, 7  ;;  %s2278_s13 = scalar_lea.hbm %s3284_s6, 1792 }
  0xcb   : > { %s369_s22 = scalar_lea.hbm %s3284_s6, %s1770_s17 }
  0xcc   : > { %s2273_s19 = scalar_lea.hbm %s369_s22, 128  ;;  %p2279_p5 = scmp.lt.u32.totalorder %s369_s22, %s3284_s6 }
  0xcd   : > { %p2274_p10 = scmp.ne.s32.totalorder %s369_s22, %s2273_s19  ;;  %p2280_p12 = scmp.lt.u32.totalorder %s2278_s13, %s2273_s19 }
  0xce   : > { %p2282_p1 = scmp.lt.u32.totalorder %s2273_s19, %s369_s22 }
  0xcf   : > { %p2276_p2 = pnand %p2274_p10, %p3353_p9  ;;  %p2281_p3 = por %p2280_p12, %p2279_p5 }
  0xd1   : > { %p2277_p7 = pneg %p2276_p2  ;;  %p2283_p4 = por %p2282_p1, %p2281_p3 }
  0xd3   : > { %p2284_p13 = pnand %p2283_p4, %p2277_p7 }
  0xd5   : > { %2287 = shalt.err (!%p2284_p13)
}
  0xd6   : > { %s2288_s8 = scalar_lea.vmem %s2855_s18, 128  ;;  %s2454_s30 = smov [#allocation15]  }
  0xd7   : > { %p2289_p8 = scmp.ne.s32.totalorder %s2855_s18, %s2288_s8  ;;  %s2293_s14 = sshll.u32 %s2454_s30, 4  ;;  %s2294_s14 = int_to_ptr.vmem [resolvable:$false] %s2293_s14 }
  0xd8   : > { %s2295_s3 = scalar_lea.vmem %s2294_s14, 256  ;;  %p2296_p10 = scmp.lt.s32.totalorder %s2855_s18, %s2294_s14 }
  0xd9   : > { %p2291_p11 = pnand %p2289_p8, %p3353_p9  ;;  %p2297_p2 = scmp.lt.s32.totalorder %s2295_s3, %s2288_s8 }
  0xdb   : > { %p2292_p6 = pneg %p2291_p11  ;;  %p2298_p5 = por %p2297_p2, %p2296_p10 }
  0xdd   : > { %p2299_p12 = pnand %p2298_p5, %p2292_p6 }
  0xdf   : > { %2302 = shalt.err (!%p2299_p12)
}
  0xe0   : > { %1958 = dma.hbm_to_vmem [thread:$0]  (!%p3354_p0), %s369_s22, 128, %s2855_s18, %s2704_s10  }
  0xe1   : > { %p3355_p7 = scmp.ne.s32.totalorder %s3350_s23, 0 }
  0xe2   : > { %p3356_p9 = scmp.eq.s32.totalorder (!%p3355_p7), %s2738_s29, 0 }
  0xe3   : > { %380 = sbr.rel (%p3355_p7) target bundleno = 1605 (0x645), region = 48 }
  0xea   : > { %2376 = dma.done.wait (%p3356_p9), [#allocation8], 1024   ;;  %p3357_p3 = pmov %p3356_p9 }
  0xeb   : > { %s3358_s9 = sld [smem:[#allocation28_spill]]  ;;  %s3359_s1 = sld [smem:[#allocation37_spill]] }
  0xec   : > { %2378 = vsyncadd (%p3357_p3), [#allocation8], 4294966272  ;;  %s386_s16 = sand.u32 1, %s2738_s29  }
  0xed   : > { %s387_s15 = scalar_lea.sflag [#allocation11], %s386_s16 }
  0xf1   : > { %s388_s24 = sand.u32 1, %s3358_s9   ;;  %p3360_p0 = scmp.ne.s32.totalorder %s3359_s1, 0 }
  0xf2   : > { %s2885_s20 = sshll.u32 %s388_s24, 3 }
  0xf3   : > { %s390_s21 = scalar_lea.vmem [#allocation10], %s2885_s20 }
  0xf4   : > { %2380 = dma.done.wait (%p3360_p0), %s387_s15, 128  }
  0xf5   : > { %2382 = vsyncadd (%p3360_p0), %s387_s15, 4294967168  ;;  %s3361_s10 = sld [smem:[#allocation26_spill]]  ;;  %s3362_s23 = sld [smem:[#allocation38_spill]] }
  0xfb   : > { %s397_s18 = sand.u32 1, %s3361_s10   ;;  %p3363_p1 = scmp.ne.s32.totalorder %s3362_s23, 0 }
  0xfc   : > { %s1774_s17 = sshll.u32 %s397_s18, 6 }
  0xfd   : > { %s2893_s5 = scalar_lea.vmem [#allocation12], %s1774_s17 }
  0xfe   : > { %2384 = dma.done.wait (%p3363_p1), %s387_s15, 1024  }
  0xff   : > { %2386 = vsyncadd (%p3363_p1), %s387_s15, 4294966272  ;;  %s405_s11 = scalar_lea.sflag [#allocation14], %s386_s16  ;;  %s2899_s22 = scalar_lea.vmem [#allocation13], %s1774_s17 }
 0x100   : > { %2388 = dma.done.wait (%p3363_p1), %s405_s11, 1152  }
 0x101   : > { %2390 = vsyncadd (%p3363_p1), %s405_s11, 4294966144  ;;  %s1776_s19 = sshll.u32 %s397_s18, 3  ;;  %p3364_p4 = pmov %p3357_p3 }
 0x102   : > { %s2905_s27 = scalar_lea.vmem [#allocation15], %s1776_s19 }
 0x103   : > { %2392 = dma.done.wait (%p3364_p4), [#allocation17], 1024   ;;  %p3365_p13 = pmov %p3357_p3 }
 0x104   : > { %s3366_s0 = sld [smem:[#allocation31_spill]]  ;;  %s3367_s13 = sld [smem:[#allocation30_spill]] }
 0x105   : > { %2394 = vsyncadd (%p3365_p13), [#allocation17], 4294966272 }
 0x10a   : > { %p463_p8 = scmp.eq.s32.totalorder %s3366_s0, 0  ;;  %p464_p11 = scmp.eq.s32.totalorder %s3367_s13, 0 }
 0x10c   : > { %p465_p6 = pnand %p464_p11, %p463_p8 }
 0x10d   : > { %v469_v0 = vld [vmem:[#allocation7] sm:$0xff] (!%p465_p6)  ;;  %v470_v1 = vld [vmem:[#allocation7 + $0x8] sm:$0xff] (!%p465_p6)  ;;  %v471_v2 = vld [vmem:[#allocation7 + $0x10] sm:$0xff] (!%p465_p6) }
 0x10e   : > { %468 = sbr.rel (%p465_p6) target bundleno = 277 (0x115), region = 76  ;;  %477 = vst [vmem:[#allocation2] sm:$0xff] (!%p465_p6), %v469_v0  ;;  %478 = vst [vmem:[#allocation2 + $0x8] sm:$0xff] (!%p465_p6), %v470_v1  ;;  %v472_v3 = vld [vmem:[#allocation7 + $0x18] sm:$0xff] (!%p465_p6)  ;;  %v473_v4 = vld [vmem:[#allocation7 + $0x20] sm:$0xff] (!%p465_p6) }
 0x10f   : > { %479 = vst [vmem:[#allocation2 + $0x10] sm:$0xff] (!%p465_p6), %v471_v2  ;;  %v474_v5 = vld [vmem:[#allocation7 + $0x28] sm:$0xff] (!%p465_p6)  ;;  %480 = vst [vmem:[#allocation2 + $0x18] sm:$0xff] (!%p465_p6), %v472_v3  ;;  %v475_v6 = vld [vmem:[#allocation7 + $0x30] sm:$0xff] (!%p465_p6) }
 0x110   : > { %481 = vst [vmem:[#allocation2 + $0x20] sm:$0xff] (!%p465_p6), %v473_v4  ;;  %482 = vst [vmem:[#allocation2 + $0x28] sm:$0xff] (!%p465_p6), %v474_v5  ;;  %v476_v7 = vld [vmem:[#allocation7 + $0x38] sm:$0xff] (!%p465_p6) }
 0x111   : > { %483 = vst [vmem:[#allocation2 + $0x30] sm:$0xff] (!%p465_p6), %v475_v6  ;;  %484 = vst [vmem:[#allocation2 + $0x38] sm:$0xff] (!%p465_p6), %v476_v7 }
 0x115 PF: > { %s3368_s12 = sld [smem:[#allocation30_spill]] }
 0x11b   : > { %p1778_p10 = scmp.ne.s32.totalorder %s3368_s12, 0 }
 0x11c   : > { %v2455_v8 = vmov (!%p1778_p10), 0.0  }
 0x11d   : > { %487 = sbr.rel (%p1778_p10) target bundleno = 292 (0x124), region = 80  ;;  %488 = vst [vmem:[#allocation3] sm:$0xff] (!%p1778_p10), %v2455_v8  ;;  %489 = vst [vmem:[#allocation3 + $0x8] sm:$0xff] (!%p1778_p10), %v2455_v8 }
 0x11e   : > { %490 = vst [vmem:[#allocation3 + $0x10] sm:$0xff] (!%p1778_p10), %v2455_v8  ;;  %491 = vst [vmem:[#allocation3 + $0x18] sm:$0xff] (!%p1778_p10), %v2455_v8 }
 0x11f   : > { %492 = vst [vmem:[#allocation3 + $0x20] sm:$0xff] (!%p1778_p10), %v2455_v8  ;;  %493 = vst [vmem:[#allocation3 + $0x28] sm:$0xff] (!%p1778_p10), %v2455_v8 }
 0x120   : > { %494 = vst [vmem:[#allocation3 + $0x30] sm:$0xff] (!%p1778_p10), %v2455_v8  ;;  %495 = vst [vmem:[#allocation3 + $0x38] sm:$0xff] (!%p1778_p10), %v2455_v8 }
 0x124 PF: > { %v2071_v9 = vld [vmem:[%s2899_s22] sm:$0xff]   ;;  %v2456_v10 = vmov 0.0   ;;  %v2073_v12 = vld [vmem:[%s2899_s22 + $0x8] sm:$0xff]   ;;  %vm2457_vm0 = vmmov 0   ;;  %s3369_s28 = sld [smem:[#allocation30_spill]]  ;;  %v2075_v14 = vld [vmem:[%s2899_s22 + $0x10] sm:$0xff]   ;;  %v736_v32 = vlaneseq }
 0x125   : > { %1870 = vmatprep.subr.bf16.mxu1 %v2456_v10  ;;  %1850 = vmatprep.subr.bf16.mxu0 %v2456_v10  ;;  %v2072_v11 = vld [vmem:[%s2893_s5] sm:$0xff]   ;;  %v2074_v13 = vld [vmem:[%s2893_s5 + $0x8] sm:$0xff]   ;;  %v2076_v15 = vld [vmem:[%s2893_s5 + $0x10] sm:$0xff]   ;;  %v2458_v38 = vmov 1966171168  }
 0x126   : > { %1871 = vmatpush3.bf16.msra.mxu1 %v2071_v9  ;;  %1886 = vmatprep.mubr.msk.bf16.mxu1 %vm2457_vm0, %v2456_v10  ;;  %v2077_v16 = vld [vmem:[%s2899_s22 + $0x18] sm:$0xff]   ;;  %v2079_v18 = vld [vmem:[%s2899_s22 + $0x20] sm:$0xff]   ;;  %v2081_v20 = vld [vmem:[%s2899_s22 + $0x28] sm:$0xff]   ;;  %v737_v33 = vshrl.u32 %v736_v32, 7  ;;  %v1177_v34 = vand.u32 127, %v736_v32  ;;  %v734_v39 = vunpack.c.l.s4 %v2458_v38 }
 0x127   : > { %1872 = vmatprep.subr.bf16.mxu1 %v2456_v10  ;;  %1851 = vmatpush3.bf16.msra.mxu0 %v2072_v11  ;;  %v2078_v17 = vld [vmem:[%s2893_s5 + $0x18] sm:$0xff]   ;;  %v2080_v19 = vld [vmem:[%s2893_s5 + $0x20] sm:$0xff]   ;;  %v2082_v21 = vld [vmem:[%s2893_s5 + $0x28] sm:$0xff]  }
 0x128   : > { %1852 = vmatprep.subr.bf16.mxu0 %v2456_v10  ;;  %1866 = vmatprep.mubr.msk.bf16.mxu0 %vm2457_vm0, %v2456_v10  ;;  %v2083_v22 = vld [vmem:[%s2899_s22 + $0x30] sm:$0xff]   ;;  %v2085_v24 = vld [vmem:[%s2899_s22 + $0x38] sm:$0xff]   ;;  %v2963_v35 = vsub.s32 %v1177_v34, %v737_v33  ;;  %v1182_v36 = vadd.s32 4294967288, %v1177_v34  ;;  %v735_v40 = vunpack.c.0.s8 %v734_v39  ;;  %v1790_v41 = vld [vmem:[%s2905_s27 + $0x1] ss:$0 sm:$0xff]  ;;  %v2972_v54 = vsub.s32 0, %v737_v33 }
 0x129   : > { %v2084_v23 = vld [vmem:[%s2893_s5 + $0x30] sm:$0xff]   ;;  %v2086_v27 = vld [vmem:[%s2893_s5 + $0x38] sm:$0xff]   ;;  %v1781_v46 = vld [vmem:[%s2905_s27] ss:$0 sm:$0xff] }
 0x12a   : > { %1873 = vmatpush3.bf16.msra.mxu1 %v2073_v12  ;;  %s2935_s8 = sld [smem:[#allocation6 + %s3369_s28]]  ;;  %v2965_v37 = vsub.s32 %v1182_v36, %v737_v33  ;;  %v2968_v42 = vsub.s32 %v735_v40, %v737_v33  ;;  %v3001_v11 = vld [vmem:[%s2905_s27 + $0x2] ss:$0 sm:$0xff]  ;;  %p1435_p2 = scmp.eq.s32.totalorder %s3369_s28, 6 }
 0x12b   : > { %1874 = vmatprep.subr.bf16.mxu1 %v2456_v10  ;;  %1853 = vmatpush3.bf16.msra.mxu0 %v2074_v13  ;;  %s2938_s30 = sld [smem:[#allocation5 + %s3369_s28]]  ;;  %p1802_p5 = scmp.ne.s32.totalorder %s3369_s28, 6 }
 0x12c   : > { %1854 = vmatprep.subr.bf16.mxu0 %v2456_v10 }
 0x12e   : > { %1875 = vmatpush3.bf16.msra.mxu1 %v2075_v14 }
 0x12f   : > { %1876 = vmatprep.subr.bf16.mxu1 %v2456_v10  ;;  %1855 = vmatpush3.bf16.msra.mxu0 %v2076_v15 }
 0x130   : > { %1856 = vmatprep.subr.bf16.mxu0 %v2456_v10  ;;  %s1780_s14 = sshll.u32 %s2935_s8, 4 }
 0x131   : > { %s1779_s3 = sshll.u32 %s2938_s30, 4  ;;  %s503_s9 = scalar_lea.vmem [#allocation2], %s1780_s14 }
 0x132   : > { %1877 = vmatpush3.bf16.msra.mxu1 %v2077_v16  ;;  %v504_v25 = vld [vmem:[%s503_s9] sm:$0xff]  ;;  %v505_v26 = vld [vmem:[%s503_s9 + $0x8] sm:$0xff]  ;;  %s499_s1 = scalar_lea.vmem [#allocation2], %s1779_s3  ;;  %s1428_s16 = scalar_lea.vmem [#allocation3], %s1780_s14 }
 0x133   : > { %1878 = vmatprep.subr.bf16.mxu1 %v2456_v10  ;;  %1857 = vmatpush3.bf16.msra.mxu0 %v2078_v17  ;;  %v500_v28 = vld [vmem:[%s499_s1] sm:$0xff]  ;;  %v501_v29 = vld [vmem:[%s499_s1 + $0x8] sm:$0xff]  ;;  %v620_v30 = vpack.c.bf16 %v505_v26, %v504_v25 }
 0x134   : > { %1858 = vmatprep.subr.bf16.mxu0 %v2456_v10  ;;  %v510_v31 = vpack.c.bf16 %v501_v29, %v500_v28 }
 0x136   : > { %1879 = vmatpush3.bf16.msra.mxu1 %v2079_v18 }
 0x137   : > { %1880 = vmatprep.subr.bf16.mxu1 %v2456_v10  ;;  %1859 = vmatpush3.bf16.msra.mxu0 %v2080_v19 }
 0x138   : > { %1860 = vmatprep.subr.bf16.mxu0 %v2456_v10 }
 0x13a   : > { %1881 = vmatpush3.bf16.msra.mxu1 %v2081_v20 }
 0x13b   : > { %1882 = vmatprep.subr.bf16.mxu1 %v2456_v10  ;;  %1861 = vmatpush3.bf16.msra.mxu0 %v2082_v21 }
 0x13c   : > { %1862 = vmatprep.subr.bf16.mxu0 %v2456_v10 }
 0x13e   : > { %1883 = vmatpush3.bf16.msra.mxu1 %v2083_v22 }
 0x13f   : > { %1884 = vmatprep.subr.bf16.mxu1 %v2456_v10  ;;  %1863 = vmatpush3.bf16.msra.mxu0 %v2084_v23 }
 0x140   : > { %1864 = vmatprep.subr.bf16.mxu0 %v2456_v10 }
 0x142   : > { %1885 = vmatpush3.bf16.msra.mxu1 %v2085_v24 }
 0x143   : > { %1865 = vmatpush3.bf16.msra.mxu0 %v2086_v27 }
 0x144   : > { %1890 = vmatprep.subr.bf16.mxu0 %v2456_v10 }
 0x145   : > { %1887 = vmatmul.mubr.bf16.vlgmr.msra.gmra.mrb[0].mxu1 %v620_v30 }
 0x146   : > { %1867 = vmatmul.mubr.bf16.vlgmr.msra.gmra.mrb[0].mxu0 %v510_v31 }
 0x147   : > { %1892 = vmatprep.mubr.msk.bf16.mxu0 %vm2457_vm0, %v2456_v10 }
 0x218   : > { %v723_v43 = vpop.f32.mrb[0].mxu1 }
 0x219   : > { %v724_v44 = vadd.f32 %v1790_v41, %v723_v43  ;;  %v1888_v45 = vpop.f32.mrb[1].mxu1  ;;  %v613_v47 = vpop.f32.mrb[0].mxu0 }
 0x21a   : > { %v726_v48 = vpop.f32.mrb[2].mxu1  ;;  %v1868_v49 = vpop.f32.mrb[1].mxu0  ;;  %v2974_v55 = vadd.f32 %v1781_v46, %v613_v47 }
 0x21b   : > { %v739_v50 = vrot.slane %v724_v44, %v2968_v42  ;;  %v727_v51 = vadd.f32 %v1790_v41, %v726_v48  ;;  %v1889_v52 = vpop.f32.mrb[3].mxu1  ;;  %v616_v53 = vpop.f32.mrb[2].mxu0  ;;  %v732_v58 = vcombine.high %v724_v44, %v724_v44 }
 0x21c   : > { %v2976_v56 = vadd.f32 %v1781_v46, %v616_v53  ;;  %v1869_v57 = vpop.f32.mrb[3].mxu0 }
 0x21d   : > { %v755_v59 = vrot.slane %v739_v50, %v2968_v42  ;;  %v747_v60 = vcombine.high %v739_v50, %v739_v50  ;;  %v788_v61 = vrot.slane %v727_v51, %v2968_v42  ;;  %v2985_v2 = vrot.slane %v732_v58, %v2968_v42 }
 0x21e   : > { %v1379_v62 = vpack.c.bf16 %v2976_v56, %v2974_v55  ;;  %v781_v3 = vcombine.high %v727_v51, %v727_v51 }
 0x21f   : > { %v777_v63 = vcombine.high %v755_v59, %v755_v59  ;;  %v833_v0 = vrot.slane %v755_v59, %v2972_v54  ;;  %v804_v1 = vrot.slane %v788_v61, %v2968_v42  ;;  %v2988_v4 = vrot.slane %v747_v60, %v2968_v42 }
 0x220   : > { %1891 = vmatpush3.bf16.msra.mxu0 %v1379_v62  ;;  %v796_v5 = vcombine.high %v788_v61, %v788_v61  ;;  %v2995_v9 = vrot.slane %v2985_v2, %v2968_v42  ;;  %v2998_v10 = vrot.slane %v781_v3, %v2968_v42  ;;  %v748_v32 = vcombine.high %v2985_v2, %v2985_v2 }
 0x221   : > { %v841_v6 = vrot.slane %v777_v63, %v2972_v54  ;;  %v865_v7 = vrot.slane %v804_v1, %v2972_v54  ;;  %v910_v8 = vadd.f32 %v833_v0, %v2974_v55  ;;  %v837_v14 = vrot.slane %v2988_v4, %v2972_v54 }
 0x222   : > { %v3004_v13 = vrot.slane %v796_v5, %v2968_v42  ;;  %v911_v15 = vadd.f32 %v833_v0, %v2976_v56  ;;  %v849_v24 = vrot.slane %v2995_v9, %v2972_v54  ;;  %v826_v25 = vcombine.high %v804_v1, %v804_v1 }
 0x223   : > { %vm942_vm1 = vcmp.gt.f32.partialorder %v910_v8, 0.0  ;;  %v974_v12 = vmul.f32 0.2, %v910_v8  ;;  %v926_v16 = vadd.f32 %v865_v7, %v2974_v55  ;;  %v927_v18 = vadd.f32 %v865_v7, %v2976_v56 }
 0x224   : > { %v914_v19 = vadd.f32 %v841_v6, %v2974_v55  ;;  %v915_v20 = vadd.f32 %v841_v6, %v2976_v56  ;;  %v912_v22 = vadd.f32 %v837_v14, %v2974_v55  ;;  %vm943_vm2 = vcmp.gt.f32.partialorder %v911_v15, 0.0 }
 0x225   : > { %v1006_v17 = vsel %vm942_vm1, %v910_v8, %v974_v12  ;;  %v975_v23 = vmul.f32 0.2, %v911_v15  ;;  %v913_v26 = vadd.f32 %v837_v14, %v2976_v56  ;;  %v990_v27 = vmul.f32 0.2, %v926_v16 }
 0x226   : > { %v1042_v21 = vmul.f32 %v3001_v11, %v1006_v17  ;;  %vm944_vm3 = vcmp.gt.f32.partialorder %v912_v22, 0.0  ;;  %v976_v28 = vmul.f32 0.2, %v912_v22  ;;  %vm958_vm4 = vcmp.gt.f32.partialorder %v926_v16, 0.0 }
 0x227   : > { %v1007_v29 = vsel %vm943_vm2, %v911_v15, %v975_v23  ;;  %v869_v30 = vrot.slane %v3004_v13, %v2972_v54  ;;  %vm945_vm5 = vcmp.gt.f32.partialorder %v913_v26, 0.0  ;;  %v977_v31 = vmul.f32 0.2, %v913_v26 }
 0x228   : > { %1074 = vadd.xlane.f32.xlu0 %v1042_v21  ;;  %v3024_v33 = vrot.slane %v2998_v10, %v2968_v42  ;;  %v1008_v34 = vsel %vm944_vm3, %v912_v22, %v976_v28  ;;  %v1043_v36 = vmul.f32 %v3001_v11, %v1007_v29  ;;  %v873_v38 = vrot.slane %v826_v25, %v2972_v54 }
 0x229   : > { %v1044_v39 = vmul.f32 %v3001_v11, %v1008_v34  ;;  %v1022_v40 = vsel %vm958_vm4, %v926_v16, %v990_v27  ;;  %v978_v41 = vmul.f32 0.2, %v914_v19  ;;  %v1009_v43 = vsel %vm945_vm5, %v913_v26, %v977_v31 }
 0x22a   : > { %v991_v44 = vmul.f32 0.2, %v927_v18  ;;  %vm946_vm6 = vcmp.gt.f32.partialorder %v914_v19, 0.0  ;;  %v918_v45 = vadd.f32 %v849_v24, %v2974_v55  ;;  %vm959_vm7 = vcmp.gt.f32.partialorder %v927_v18, 0.0 }
 0x22b   : > { %1078 = vadd.xlane.f32.xlu1 %v1044_v39  ;;  %v919_v46 = vadd.f32 %v849_v24, %v2976_v56  ;;  %v928_v47 = vadd.f32 %v869_v30, %v2974_v55  ;;  %v929_v48 = vadd.f32 %v869_v30, %v2976_v56  ;;  %v779_v49 = vcombine.high %v2988_v4, %v2988_v4 }
 0x22c   : > { %1076 = vadd.xlane.f32.xlu0 %v1043_v36  ;;  %v1058_v50 = vmul.f32 %v3001_v11, %v1022_v40  ;;  %v1045_v51 = vmul.f32 %v3001_v11, %v1009_v43  ;;  %v1010_v52 = vsel %vm946_vm6, %v914_v19, %v978_v41  ;;  %v979_v53 = vmul.f32 0.2, %v915_v20 }
 0x22d   : > { %v982_v57 = vmul.f32 0.2, %v918_v45  ;;  %v1023_v58 = vsel %vm959_vm7, %v927_v18, %v991_v44  ;;  %vm947_vm8 = vcmp.gt.f32.partialorder %v915_v20, 0.0  ;;  %vm950_vm9 = vcmp.gt.f32.partialorder %v918_v45, 0.0 }
 0x22e   : > { %v3038_v59 = vrot.slane %v748_v32, %v2968_v42  ;;  %v881_v60 = vrot.slane %v3024_v33, %v2972_v54  ;;  %v930_v61 = vadd.f32 %v873_v38, %v2974_v55  ;;  %v931_v62 = vadd.f32 %v873_v38, %v2976_v56 }
 0x22f   : > { %1080 = vadd.xlane.f32.xlu1 %v1045_v51  ;;  %v797_v63 = vcombine.high %v2998_v10, %v2998_v10  ;;  %v1046_v0 = vmul.f32 %v3001_v11, %v1010_v52  ;;  %v845_v1 = vrot.slane %v779_v49, %v2972_v54  ;;  %v1059_v2 = vmul.f32 %v3001_v11, %v1023_v58 }
 0x230   : > { %1106 = vadd.xlane.f32.xlu0 %v1058_v50  ;;  %v1011_v3 = vsel %vm947_vm8, %v915_v20, %v979_v53  ;;  %v1014_v4 = vsel %vm950_vm9, %v918_v45, %v982_v57  ;;  %v992_v5 = vmul.f32 0.2, %v928_v47  ;;  %v983_v6 = vmul.f32 0.2, %v919_v46 }
 0x231   : > { %vm960_vm10 = vcmp.gt.f32.partialorder %v928_v47, 0.0  ;;  %v916_v7 = vadd.f32 %v845_v1, %v2974_v55  ;;  %v917_v8 = vadd.f32 %v845_v1, %v2976_v56  ;;  %vm951_vm11 = vcmp.gt.f32.partialorder %v919_v46, 0.0 }
 0x232   : > { %v934_v10 = vadd.f32 %v881_v60, %v2974_v55  ;;  %v3053_v12 = vadd.f32 %v881_v60, %v2976_v56  ;;  %v853_v14 = vrot.slane %v3038_v59, %v2972_v54  ;;  %v778_v15 = vcombine.high %v2995_v9, %v2995_v9 }
 0x233   : > { %1108 = vadd.xlane.f32.xlu1 %v1059_v2  ;;  %v1050_v16 = vmul.f32 %v3001_v11, %v1014_v4  ;;  %v993_v17 = vmul.f32 0.2, %v929_v48  ;;  %v1047_v18 = vmul.f32 %v3001_v11, %v1011_v3  ;;  %v1024_v19 = vsel %vm960_vm10, %v928_v47, %v992_v5 }
 0x234   : > { %1082 = vadd.xlane.f32.xlu0 %v1046_v0  ;;  %vm961_vm12 = vcmp.gt.f32.partialorder %v929_v48, 0.0  ;;  %v994_v20 = vmul.f32 0.2, %v930_v61  ;;  %v1015_v21 = vsel %vm951_vm11, %v919_v46, %v983_v6  ;;  %vm962_vm13 = vcmp.gt.f32.partialorder %v930_v61, 0.0 }
 0x235   : > { %v825_v22 = vrot.slane %v797_v63, %v2968_v42  ;;  %v828_v23 = vcombine.high %v3004_v13, %v3004_v13  ;;  %v920_v24 = vadd.f32 %v853_v14, %v2974_v55  ;;  %v3066_v9 = vadd.f32 %v853_v14, %v2976_v56 }
 0x236   : > { %v1060_v25 = vmul.f32 %v3001_v11, %v1024_v19  ;;  %v1025_v26 = vsel %vm961_vm12, %v929_v48, %v993_v17  ;;  %v995_v27 = vmul.f32 0.2, %v931_v62  ;;  %v857_v28 = vrot.slane %v778_v15, %v2972_v54 }
 0x237   : > { %1084 = vadd.xlane.f32.xlu1 %v1047_v18  ;;  %v1051_v29 = vmul.f32 %v3001_v11, %v1015_v21  ;;  %v1026_v30 = vsel %vm962_vm13, %v930_v61, %v994_v20  ;;  %vm963_vm14 = vcmp.gt.f32.partialorder %v931_v62, 0.0  ;;  %v980_v42 = vmul.f32 0.2, %v916_v7 }
 0x238   : > { %1090 = vadd.xlane.f32.xlu0 %v1050_v16  ;;  %v827_v13 = vcombine.high %v3024_v33, %v3024_v33  ;;  %vm948_vm15 = vcmp.gt.f32.partialorder %v916_v7, 0.0  ;;  %v922_v31 = vadd.f32 %v857_v28, %v2974_v55  ;;  %v3075_v32 = vadd.f32 %v857_v28, %v2976_v56 }
 0x239   : > { %v1061_v34 = vmul.f32 %v3001_v11, %v1025_v26  ;;  %v877_v36 = vrot.slane %v828_v23, %v2972_v54  ;;  %v885_v38 = vrot.slane %v825_v22, %v2972_v54  ;;  %v1062_v39 = vmul.f32 %v3001_v11, %v1026_v30 }
 0x23a   : > { %v1027_v40 = vsel %vm963_vm14, %v931_v62, %v995_v27  ;;  %vm949_vm0 = vcmp.gt.f32.partialorder %v917_v8, 0.0  ;;  %v981_v41 = vmul.f32 0.2, %v917_v8  ;;  %v1012_v33 = vsel %vm948_vm15, %v916_v7, %v980_v42 }
 0x23b   : > { %1092 = vadd.xlane.f32.xlu1 %v1051_v29  ;;  %vm966_vm1 = vcmp.gt.f32.partialorder %v934_v10, 0.0  ;;  %v998_v43 = vmul.f32 0.2, %v934_v10  ;;  %v932_v44 = vadd.f32 %v877_v36, %v2974_v55  ;;  %v3083_v45 = vadd.f32 %v877_v36, %v2976_v56 }
 0x23c   : > { %1110 = vadd.xlane.f32.xlu0 %v1060_v25  ;;  %v936_v46 = vadd.f32 %v885_v38, %v2974_v55  ;;  %v3087_v47 = vadd.f32 %v885_v38, %v2976_v56  ;;  %v889_v48 = vrot.slane %v827_v13, %v2972_v54  ;;  %v780_v49 = vcombine.high %v3038_v59, %v3038_v59 }
 0x23d   : > { %v829_v50 = vcombine.high %v825_v22, %v825_v22  ;;  %v1048_v51 = vmul.f32 %v3001_v11, %v1012_v33  ;;  %v1063_v52 = vmul.f32 %v3001_v11, %v1027_v40  ;;  %v1013_v53 = vsel %vm949_vm0, %v917_v8, %v981_v41 }
 0x23e   : > { %v1030_v57 = vsel %vm966_vm1, %v934_v10, %v998_v43  ;;  %v984_v58 = vmul.f32 0.2, %v920_v24  ;;  %v999_v60 = vmul.f32 0.2, %v3053_v12  ;;  %vm952_vm2 = vcmp.gt.f32.partialorder %v920_v24, 0.0 }
 0x23f   : > { %1112 = vadd.xlane.f32.xlu1 %v1061_v34  ;;  %v938_v61 = vadd.f32 %v889_v48, %v2974_v55  ;;  %v3098_v62 = vadd.f32 %v889_v48, %v2976_v56  ;;  %vm967_vm3 = vcmp.gt.f32.partialorder %v3053_v12, 0.0  ;;  %v861_v59 = vrot.slane %v780_v49, %v2972_v54 }
 0x240   : > { %1114 = vadd.xlane.f32.xlu0 %v1062_v39  ;;  %v1049_v63 = vmul.f32 %v3001_v11, %v1013_v53  ;;  %v1066_v0 = vmul.f32 %v3001_v11, %v1030_v57  ;;  %v1016_v1 = vsel %vm952_vm2, %v920_v24, %v984_v58  ;;  %v986_v2 = vmul.f32 0.2, %v922_v31 }
 0x241   : > { %v924_v3 = vadd.f32 %v861_v59, %v2974_v55  ;;  %v3106_v4 = vadd.f32 %v861_v59, %v2976_v56  ;;  %v1031_v5 = vsel %vm967_vm3, %v3053_v12, %v999_v60  ;;  %v985_v6 = vmul.f32 0.2, %v3066_v9 }
 0x242   : > { %vm954_vm4 = vcmp.gt.f32.partialorder %v922_v31, 0.0  ;;  %v893_v7 = vrot.slane %v829_v50, %v2972_v54  ;;  %vm953_vm5 = vcmp.gt.f32.partialorder %v3066_v9, 0.0  ;;  %v1052_v8 = vmul.f32 %v3001_v11, %v1016_v1 }
 0x243   : > { %1116 = vadd.xlane.f32.xlu1 %v1063_v52  ;;  %v1067_v14 = vmul.f32 %v3001_v11, %v1031_v5  ;;  %v1018_v15 = vsel %vm954_vm4, %v922_v31, %v986_v2  ;;  %v996_v16 = vmul.f32 0.2, %v932_v44  ;;  %v1017_v12 = vsel %vm953_vm5, %v3066_v9, %v985_v6 }
 0x244   : > { %1086 = vadd.xlane.f32.xlu0 %v1048_v51  ;;  %v940_v10 = vadd.f32 %v893_v7, %v2974_v55  ;;  %v941_v17 = vadd.f32 %v893_v7, %v2976_v56  ;;  %v987_v18 = vmul.f32 0.2, %v3075_v32  ;;  %vm964_vm6 = vcmp.gt.f32.partialorder %v932_v44, 0.0 }
 0x245   : > { %vm955_vm7 = vcmp.gt.f32.partialorder %v3075_v32, 0.0  ;;  %v1054_v19 = vmul.f32 %v3001_v11, %v1018_v15  ;;  %v1053_v55 = vmul.f32 %v3001_v11, %v1017_v12  ;;  %v1028_v20 = vsel %vm964_vm6, %v932_v44, %v996_v16 }
 0x246   : > { %vm973_vm8 = vcmp.gt.f32.partialorder %v941_v17, 0.0  ;;  %v1005_v54 = vmul.f32 0.2, %v941_v17  ;;  %v1000_v21 = vmul.f32 0.2, %v936_v46  ;;  %v1019_v56 = vsel %vm955_vm7, %v3075_v32, %v987_v18 }
 0x247   : > { %1088 = vadd.xlane.f32.xlu1 %v1049_v63  ;;  %v997_v23 = vmul.f32 0.2, %v3083_v45  ;;  %vm968_vm9 = vcmp.gt.f32.partialorder %v936_v46, 0.0  ;;  %vm965_vm10 = vcmp.gt.f32.partialorder %v3083_v45, 0.0  ;;  %v1064_v9 = vmul.f32 %v3001_v11, %v1028_v20 }
 0x248   : > { %1122 = vadd.xlane.f32.xlu0 %v1066_v0  ;;  %v1037_v22 = vsel %vm973_vm8, %v941_v17, %v1005_v54  ;;  %v1055_v25 = vmul.f32 %v3001_v11, %v1019_v56  ;;  %v1032_v26 = vsel %vm968_vm9, %v936_v46, %v1000_v21  ;;  %v1002_v27 = vmul.f32 0.2, %v938_v61 }
 0x249   : > { %v1073_v24 = vmul.f32 %v3001_v11, %v1037_v22  ;;  %v1029_v28 = vsel %vm965_vm10, %v3083_v45, %v997_v23  ;;  %v1001_v29 = vmul.f32 0.2, %v3087_v47  ;;  %vm970_vm11 = vcmp.gt.f32.partialorder %v938_v61, 0.0 }
 0x24a   : > { %vm969_vm12 = vcmp.gt.f32.partialorder %v3087_v47, 0.0  ;;  %v1068_v30 = vmul.f32 %v3001_v11, %v1032_v26  ;;  %v1065_v42 = vmul.f32 %v3001_v11, %v1029_v28  ;;  %v1034_v13 = vsel %vm970_vm11, %v938_v61, %v1002_v27 }
 0x24b   : > { %1124 = vadd.xlane.f32.xlu1 %v1067_v14  ;;  %v988_v31 = vmul.f32 0.2, %v924_v3  ;;  %v1033_v32 = vsel %vm969_vm12, %v3087_v47, %v1001_v29  ;;  %v1003_v34 = vmul.f32 0.2, %v3098_v62  ;;  %vm956_vm13 = vcmp.gt.f32.partialorder %v924_v3, 0.0 }
 0x24c   : > { %1094 = vadd.xlane.f32.xlu0 %v1052_v8  ;;  %vm971_vm14 = vcmp.gt.f32.partialorder %v3098_v62, 0.0  ;;  %v1070_v36 = vmul.f32 %v3001_v11, %v1034_v13  ;;  %v1069_v38 = vmul.f32 %v3001_v11, %v1033_v32  ;;  %v1004_v40 = vmul.f32 0.2, %v940_v10 }
 0x24d   : > { %v1020_v39 = vsel %vm956_vm13, %v924_v3, %v988_v31  ;;  %v1035_v41 = vsel %vm971_vm14, %v3098_v62, %v1003_v34  ;;  %v989_v33 = vmul.f32 0.2, %v3106_v4  ;;  %vm972_vm15 = vcmp.gt.f32.partialorder %v940_v10, 0.0 }
 0x24e   : > { %vm957_vm0 = vcmp.gt.f32.partialorder %v3106_v4, 0.0  ;;  %v1056_v43 = vmul.f32 %v3001_v11, %v1020_v39  ;;  %v1071_v44 = vmul.f32 %v3001_v11, %v1035_v41  ;;  %v1036_v45 = vsel %vm972_vm15, %v940_v10, %v1004_v40 }
 0x24f   : > { %1096 = vadd.xlane.f32.xlu1 %v1053_v55  ;;  %v1021_v46 = vsel %vm957_vm0, %v3106_v4, %v989_v33  ;;  %v1072_v47 = vmul.f32 %v3001_v11, %v1036_v45  ;;  %vm1187_vm1 = vcmask 130112   ;;  %vm1324_vm2 = vcmask 1041409  }
 0x250   : > { %1098 = vadd.xlane.f32.xlu0 %v1054_v19  ;;  %v1057_v48 = vmul.f32 %v3001_v11, %v1021_v46  ;;  %vm1326_vm3 = vcmask 1042434   ;;  %vm1328_vm4 = vcmask 1043459   ;;  %vm1330_vm5 = vcmask 1044484  }
 0x251   : > { %vm1332_vm6 = vcmask 1045509   ;;  %vm1334_vm7 = vcmask 1046534   ;;  %vm1336_vm8 = vcmask 1047559   ;;  %vm1349_vm10 = vcmask 130048  }
 0x253   : > { %1100 = vadd.xlane.f32.xlu1 %v1055_v25 }
 0x254   : > { %1118 = vadd.xlane.f32.xlu0 %v1064_v9 }
 0x257   : > { %1120 = vadd.xlane.f32.xlu1 %v1065_v42 }
 0x258   : > { %1126 = vadd.xlane.f32.xlu0 %v1068_v30 }
 0x25b   : > { %1128 = vadd.xlane.f32.xlu1 %v1069_v38 }
 0x25c   : > { %1130 = vadd.xlane.f32.xlu0 %v1070_v36 }
 0x25f   : > { %1132 = vadd.xlane.f32.xlu1 %v1071_v44 }
 0x260   : > { %1102 = vadd.xlane.f32.xlu0 %v1056_v43 }
 0x263   : > { %1104 = vadd.xlane.f32.xlu1 %v1057_v48 }
 0x264   : > { %1134 = vadd.xlane.f32.xlu0 %v1072_v47 }
 0x267   : > { %1136 = vadd.xlane.f32.xlu1 %v1073_v24 }
 0x2b5   : > { %v1075_v49 = vpop.xlane.xlu0 %1074 }
 0x2b6   : > { %v1181_v51 = vrot.slane %v1075_v49, %v2963_v35 }
 0x2b8   : > { %v1079_v52 = vpop.xlane.xlu1 %1078 }
 0x2b9   : > { %v1077_v50 = vpop.xlane.xlu0 %1076  ;;  %v1192_v61 = vrot.slane %v1079_v52, %v2963_v35 }
 0x2ba   : > { %v1186_v53 = vrot.slane %v1077_v50, %v2965_v37 }
 0x2bc   : > { %v1188_v57 = vsel %vm1187_vm1, %v1186_v53, %v1181_v51  ;;  %v1081_v60 = vpop.xlane.xlu1 %1080 }
 0x2bd   : > { %v1107_v58 = vpop.xlane.xlu0 %1106  ;;  %v1196_v11 = vrot.slane %v1081_v60, %v2965_v37 }
 0x2be   : > { %v1255_v1 = vrot.slane %v1107_v58, %v2963_v35 }
 0x2bf   : > { %v1197_v62 = vsel %vm1187_vm1, %v1196_v11, %v1192_v61 }
 0x2c0   : > { %v1325_v63 = vsel %vm1324_vm2, %v1197_v62, %v1188_v57  ;;  %v1109_v0 = vpop.xlane.xlu1 %1108 }
 0x2c1   : > { %v1083_v59 = vpop.xlane.xlu0 %1082  ;;  %v1259_v2 = vrot.slane %v1109_v0, %v2965_v37 }
 0x2c2   : > { %v1201_v6 = vrot.slane %v1083_v59, %v2963_v35 }
 0x2c3   : > { %v1260_v3 = vsel %vm1187_vm1, %v1259_v2, %v1255_v1  ;;  %v1818_v1 = vld [vmem:[%s390_s21] sm:$0xff]  }
 0x2c4   : > { %v1085_v5 = vpop.xlane.xlu1 %1084 }
 0x2c5   : > { %v1091_v4 = vpop.xlane.xlu0 %1090  ;;  %v1205_v7 = vrot.slane %v1085_v5, %v2965_v37 }
 0x2c6   : > { %v1219_v16 = vrot.slane %v1091_v4, %v2963_v35 }
 0x2c7   : > { %v1206_v8 = vsel %vm1187_vm1, %v1205_v7, %v1201_v6  ;;  %v1819_v7 = vunpack.c.l.bf16 %v1818_v1 }
 0x2c8   : > { %v1327_v14 = vsel %vm1326_vm3, %v1206_v8, %v1325_v63  ;;  %v1093_v15 = vpop.xlane.xlu1 %1092 }
 0x2c9   : > { %v1111_v10 = vpop.xlane.xlu0 %1110  ;;  %v1223_v17 = vrot.slane %v1093_v15, %v2965_v37  ;;  %vm1142_vm9 = vcmp.gt.f32.partialorder %v1819_v7, 0.0 }
 0x2ca   : > { %v1264_v19 = vrot.slane %v1111_v10, %v2963_v35 }
 0x2cb   : > { %v1224_v12 = vsel %vm1187_vm1, %v1223_v17, %v1219_v16 }
 0x2cc   : > { %v1113_v54 = vpop.xlane.xlu1 %1112 }
 0x2cd   : > { %v1115_v18 = vpop.xlane.xlu0 %1114  ;;  %v1268_v55 = vrot.slane %v1113_v54, %v2965_v37 }
 0x2ce   : > { %v1273_v23 = vrot.slane %v1115_v18, %v2963_v35 }
 0x2cf   : > { %v1269_v20 = vsel %vm1187_vm1, %v1268_v55, %v1264_v19 }
 0x2d0   : > { %v1338_v22 = vsel %vm1324_vm2, %v1269_v20, %v1260_v3  ;;  %v1117_v56 = vpop.xlane.xlu1 %1116 }
 0x2d1   : > { %v1087_v21 = vpop.xlane.xlu0 %1086  ;;  %v1277_v24 = vrot.slane %v1117_v56, %v2965_v37 }
 0x2d2   : > { %v1210_v28 = vrot.slane %v1087_v21, %v2963_v35 }
 0x2d3   : > { %v1278_v9 = vsel %vm1187_vm1, %v1277_v24, %v1273_v23 }
 0x2d4   : > { %v1339_v26 = vsel %vm1326_vm3, %v1278_v9, %v1338_v22  ;;  %v1089_v27 = vpop.xlane.xlu1 %1088 }
 0x2d5   : > { %v1123_v25 = vpop.xlane.xlu0 %1122  ;;  %v1214_v29 = vrot.slane %v1089_v27, %v2965_v37 }
 0x2d6   : > { %v1291_v32 = vrot.slane %v1123_v25, %v2963_v35 }
 0x2d7   : > { %v1215_v30 = vsel %vm1187_vm1, %v1214_v29, %v1210_v28 }
 0x2d8   : > { %v1329_v13 = vsel %vm1328_vm4, %v1215_v30, %v1327_v14  ;;  %v1125_v31 = vpop.xlane.xlu1 %1124 }
 0x2d9   : > { %v1095_v42 = vpop.xlane.xlu0 %1094  ;;  %v1295_v34 = vrot.slane %v1125_v31, %v2965_v37  ;;  %v1331_v36 = vsel %vm1330_vm5, %v1224_v12, %v1329_v13  ;;  %v1820_v12 = vunpack.c.h.bf16 %v1818_v1 }
 0x2da   : > { %v1228_v41 = vrot.slane %v1095_v42, %v2963_v35 }
 0x2db   : > { %v1296_v38 = vsel %vm1187_vm1, %v1295_v34, %v1291_v32  ;;  %vm1143_vm11 = vcmp.gt.f32.partialorder %v1820_v12, 0.0 }
 0x2dc   : > { %v1097_v40 = vpop.xlane.xlu1 %1096 }
 0x2dd   : > { %v1099_v39 = vpop.xlane.xlu0 %1098  ;;  %v1232_v33 = vrot.slane %v1097_v40, %v2965_v37 }
 0x2de   : > { %v1237_v47 = vrot.slane %v1099_v39, %v2963_v35 }
 0x2df   : > { %v1233_v43 = vsel %vm1187_vm1, %v1232_v33, %v1228_v41 }
 0x2e0   : > { %v1101_v45 = vpop.xlane.xlu1 %1100  ;;  %v1333_v46 = vsel %vm1332_vm6, %v1233_v43, %v1331_v36 }
 0x2e1   : > { %v1119_v44 = vpop.xlane.xlu0 %1118  ;;  %v1241_v48 = vrot.slane %v1101_v45, %v2965_v37  ;;  %v1800_v45 = vld [vmem:[%s2905_s27 + $0x3] ss:$0 sm:$0xff] }
 0x2e2   : > { %v1282_v53 = vrot.slane %v1119_v44, %v2963_v35 }
 0x2e3   : > { %v1242_v49 = vsel %vm1187_vm1, %v1241_v48, %v1237_v47  ;;  %v1429_v47 = vld [vmem:[%s1428_s16] sm:$0xff] }
 0x2e4   : > { %v1121_v51 = vpop.xlane.xlu1 %1120  ;;  %v1335_v52 = vsel %vm1334_vm7, %v1242_v49, %v1333_v46 }
 0x2e5   : > { %v1127_v50 = vpop.xlane.xlu0 %1126  ;;  %v1286_v57 = vrot.slane %v1121_v51, %v2965_v37  ;;  %v1430_v51 = vld [vmem:[%s1428_s16 + $0x8] sm:$0xff] }
 0x2e6   : > { %v1300_v62 = vrot.slane %v1127_v50, %v2963_v35 }
 0x2e7   : > { %v1287_v58 = vsel %vm1187_vm1, %v1286_v57, %v1282_v53 }
 0x2e8   : > { %v1340_v61 = vsel %vm1328_vm4, %v1287_v58, %v1339_v26  ;;  %v1129_v11 = vpop.xlane.xlu1 %1128 }
 0x2e9   : > { %v1131_v60 = vpop.xlane.xlu0 %1130  ;;  %v1304_v59 = vrot.slane %v1129_v11, %v2965_v37  ;;  %v1341_v63 = vsel %vm1330_vm5, %v1296_v38, %v1340_v61 }
 0x2ea   : > { %v1309_v5 = vrot.slane %v1131_v60, %v2963_v35 }
 0x2eb   : > { %v1305_v0 = vsel %vm1187_vm1, %v1304_v59, %v1300_v62 }
 0x2ec   : > { %v1133_v2 = vpop.xlane.xlu1 %1132  ;;  %v1342_v4 = vsel %vm1332_vm6, %v1305_v0, %v1341_v63 }
 0x2ed   : > { %v1103_v3 = vpop.xlane.xlu0 %1102  ;;  %v1313_v6 = vrot.slane %v1133_v2, %v2965_v37 }
 0x2ee   : > { %v1246_v15 = vrot.slane %v1103_v3, %v2963_v35 }
 0x2ef   : > { %v1314_v8 = vsel %vm1187_vm1, %v1313_v6, %v1309_v5 }
 0x2f0   : > { %v1105_v10 = vpop.xlane.xlu1 %1104  ;;  %v1343_v14 = vsel %vm1334_vm7, %v1314_v8, %v1342_v4 }
 0x2f1   : > { %v1250_v16 = vrot.slane %v1105_v10, %v2965_v37  ;;  %v1135_v17 = vpop.xlane.xlu0 %1134 }
 0x2f2   : > { %v1318_v55 = vrot.slane %v1135_v17, %v2963_v35 }
 0x2f3   : > { %v1251_v18 = vsel %vm1187_vm1, %v1250_v16, %v1246_v15 }
 0x2f4   : > { %v1137_v54 = vpop.xlane.xlu1 %1136  ;;  %v1337_v19 = vsel %vm1336_vm8, %v1251_v18, %v1335_v52 }
 0x2f5   : > { %v1322_v20 = vrot.slane %v1137_v54, %v2965_v37  ;;  %v1347_v21 = vsel %vm1142_vm9, %v1337_v19, -1e+30 }
 0x2f6   : > { %v1350_v22 = vsel %vm1349_vm10, %v1347_v21, -inf }
 0x2f7   : > { %1351 = vmax.xlane.f32.xlu0 %v1350_v22  ;;  %v1323_v56 = vsel %vm1187_vm1, %v1322_v20, %v1318_v55 }
 0x2f8   : > { %v1344_v23 = vsel %vm1336_vm8, %v1323_v56, %v1343_v14 }
 0x2f9   : > { %v1348_v24 = vsel %vm1143_vm11, %v1344_v23, -1e+30 }
 0x2fa   : > { %v1353_v9 = vsel %vm1349_vm10, %v1348_v24, -inf }
 0x2fb   : > { %1354 = vmax.xlane.f32.xlu1 %v1353_v9 }
 0x384   : > { %v1352_v25 = vpop.xlane.xlu0 %1351 }
 0x385   : > { %v1356_v26 = vsub.f32 %v1347_v21, %v1352_v25 }
 0x387   : > { %v1358_v27 = vmul.f32 1.442695, %v1356_v26 }
 0x388   : > { %v1355_v28 = vpop.xlane.xlu1 %1354 }
 0x389   : > { %2087 = vpow2.f32 %v1358_v27  ;;  %v1357_v35 = vsub.f32 %v1348_v24, %v1355_v28 }
 0x38b   : > { %v1360_v29 = vmul.f32 1.442695, %v1357_v35 }
 0x38d   : > { %2089 = vpow2.f32 %v1360_v29 }
 0x393   : > { %v2088_v37 = vpop.eup %2087 }
 0x394   : > { %v1362_v30 = vmul.f32 %v2088_v37, %v1819_v7 }
 0x396   : > { %v1364_v42 = vsel %vm1349_vm10, %v1362_v30, 0.0 }
 0x397   : > { %v2090_v13 = vpop.eup %2089  ;;  %1365 = vadd.xlane.f32.xlu0 %v1364_v42 }
 0x398   : > { %v1363_v31 = vmul.f32 %v2090_v13, %v1820_v12 }
 0x39a   : > { %v1367_v32 = vsel %vm1349_vm10, %v1363_v31, 0.0 }
 0x39b   : > { %1368 = vadd.xlane.f32.xlu1 %v1367_v32 }
 0x424   : > { %v1366_v34 = vpop.xlane.xlu0 %1365 }
 0x425   : > { %vm1370_vm12 = vcmp.gt.f32.partialorder %v1366_v34, 0.0 }
 0x426   : > { %v1372_v36 = vsel %vm1370_vm12, %v1366_v34, 1.0 }
 0x427   : > { %2091 = vrcp.f32 %v1372_v36 }
 0x428   : > { %v1369_v38 = vpop.xlane.xlu1 %1368 }
 0x429   : > { %vm1371_vm13 = vcmp.gt.f32.partialorder %v1369_v38, 0.0 }
 0x42a   : > { %v1373_v39 = vsel %vm1371_vm13, %v1369_v38, 1.0 }
 0x42b   : > { %2093 = vrcp.f32 %v1373_v39 }
 0x431   : > { %v2092_v40 = vpop.eup %2091 }
 0x432   : > { %v1376_v33 = vmul.f32 %v2092_v40, %v1362_v30 }
 0x435   : > { %v2094_v41 = vpop.eup %2093 }
 0x436   : > { %v1377_v43 = vmul.f32 %v2094_v41, %v1363_v31 }
 0x438   : > { %v1378_v44 = vpack.c.bf16 %v1377_v43, %v1376_v33 }
 0x43a   : > { %1893 = vmatmul.mubr.msk.bf16.vlgmr.msra.gmra.mrb[4].mxu0 %vm1349_vm10, %v1378_v44 }
 0x50d   : > { %v1421_v46 = vpop.f32.mrb[4].mxu0 }
 0x50e   : > { %v1422_v48 = vadd.f32 %v1800_v45, %v1421_v46  ;;  %v1894_v49 = vpop.f32.mrb[5].mxu0  ;;  %1438 = sbr.rel (%p1802_p5) target bundleno = 1314 (0x522), region = 84 }
 0x50f   : > { %v1424_v50 = vpop.f32.mrb[6].mxu0 }
 0x510   : > { %v1431_v52 = vadd.f32 %v1429_v47, %v1422_v48  ;;  %v1425_v53 = vadd.f32 %v1800_v45, %v1424_v50  ;;  %v1895_v57 = vpop.f32.mrb[7].mxu0 }
 0x512   : > { %1433 = vst [vmem:[%s1428_s16] sm:$0xff] %v1431_v52  ;;  %v1432_v58 = vadd.f32 %v1430_v51, %v1425_v53 }
 0x514   : > { %1434 = vst [vmem:[%s1428_s16 + $0x8] sm:$0xff] %v1432_v58 }
 0x51b   : > { %v1439_v60 = vld [vmem:[#allocation3] sm:$0xff]  ;;  %v1440_v61 = vld [vmem:[#allocation3 + $0x8] sm:$0xff]  ;;  %v1441_v11 = vld [vmem:[#allocation3 + $0x10] sm:$0xff] }
 0x51c   : > { %v1447_v62 = vmax.f32 %v1439_v60, 0.0  ;;  %v1448_v59 = vmax.f32 %v1440_v61, 0.0  ;;  %v1449_v63 = vmax.f32 %v1441_v11, 0.0  ;;  %v1442_v0 = vld [vmem:[#allocation3 + $0x18] sm:$0xff]  ;;  %v1443_v1 = vld [vmem:[#allocation3 + $0x20] sm:$0xff]  ;;  %v1444_v2 = vld [vmem:[#allocation3 + $0x28] sm:$0xff] }
 0x51d   : > { %v1450_v3 = vmax.f32 %v1442_v0, 0.0  ;;  %v1451_v4 = vmax.f32 %v1443_v1, 0.0  ;;  %v1452_v5 = vmax.f32 %v1444_v2, 0.0  ;;  %v1445_v6 = vld [vmem:[#allocation3 + $0x30] sm:$0xff]  ;;  %v1446_v7 = vld [vmem:[#allocation3 + $0x38] sm:$0xff] }
 0x51e   : > { %1455 = vst [vmem:[#allocation2] sm:$0xff] %v1447_v62  ;;  %1456 = vst [vmem:[#allocation2 + $0x8] sm:$0xff] %v1448_v59  ;;  %v1453_v8 = vmax.f32 %v1445_v6, 0.0  ;;  %v1454_v10 = vmax.f32 %v1446_v7, 0.0 }
 0x51f   : > { %1457 = vst [vmem:[#allocation2 + $0x10] sm:$0xff] %v1449_v63  ;;  %1458 = vst [vmem:[#allocation2 + $0x18] sm:$0xff] %v1450_v3 }
 0x520   : > { %1459 = vst [vmem:[#allocation2 + $0x20] sm:$0xff] %v1451_v4  ;;  %1460 = vst [vmem:[#allocation2 + $0x28] sm:$0xff] %v1452_v5 }
 0x521   : > { %1461 = vst [vmem:[#allocation2 + $0x30] sm:$0xff] %v1453_v8  ;;  %1462 = vst [vmem:[#allocation2 + $0x38] sm:$0xff] %v1454_v10 }
 0x522 PF: > { %s3370_s24 = sld [smem:[#allocation31_spill]] }
 0x528   : > { %p1463_p12 = scmp.eq.s32.totalorder %s3370_s24, 1 }
 0x52a   : > { %p1464_p7 = pnand %p1463_p12, %p1435_p2 }
 0x52b   : > { %v2095_v14 = vld [vmem:[#allocation16] sm:$0xff] (!%p1464_p7)   ;;  %v2459_v15 = vmov (!%p1464_p7), 0.0   ;;  %v2096_v16 = vld [vmem:[#allocation16 + $0x8] sm:$0xff] (!%p1464_p7)   ;;  %vm2460_vm14 = vmmov (!%p1464_p7), 0   ;;  %v2097_v17 = vld [vmem:[#allocation16 + $0x10] sm:$0xff] (!%p1464_p7)   ;;  %s3372_s10 = sld [smem:[#allocation41_spill]] (!%p1464_p7) }
 0x52c   : > { %1467 = sbr.rel (%p1464_p7) target bundleno = 1573 (0x625), region = 88  ;;  %1896 = vmatprep.subr.bf16.mxu0 (!%p1464_p7), %v2459_v15  ;;  %1912 = vmatprep.mubr.msk.bf16.mxu0 (!%p1464_p7), %vm2460_vm14, %v2459_v15  ;;  %v2098_v12 = vld [vmem:[#allocation16 + $0x18] sm:$0xff] (!%p1464_p7)   ;;  %v2099_v18 = vld [vmem:[#allocation16 + $0x20] sm:$0xff] (!%p1464_p7)   ;;  %v2100_v54 = vld [vmem:[#allocation16 + $0x28] sm:$0xff] (!%p1464_p7)  }
 0x52d   : > { %1897 = vmatpush3.bf16.msra.mxu0 (!%p1464_p7), %v2095_v14  ;;  %v2101_v19 = vld [vmem:[#allocation16 + $0x30] sm:$0xff] (!%p1464_p7)   ;;  %v2102_v55 = vld [vmem:[#allocation16 + $0x38] sm:$0xff] (!%p1464_p7)   ;;  %v1468_v20 = vld [vmem:[#allocation2] sm:$0xff] (!%p1464_p7) }
 0x52e   : > { %1898 = vmatprep.subr.bf16.mxu0 (!%p1464_p7), %v2459_v15  ;;  %v1469_v21 = vld [vmem:[#allocation2 + $0x8] sm:$0xff] (!%p1464_p7) }
 0x52f   : > { %v1470_v22 = vpack.c.bf16 (!%p1464_p7), %v1469_v21, %v1468_v20 }
 0x531   : > { %1899 = vmatpush3.bf16.msra.mxu0 (!%p1464_p7), %v2096_v16  ;;  %v1803_v56 = vld [vmem:[%s3372_s10] ss:$0 sm:$0xff] (!%p1464_p7) }
 0x532   : > { %1900 = vmatprep.subr.bf16.mxu0 (!%p1464_p7), %v2459_v15 }
 0x535   : > { %1901 = vmatpush3.bf16.msra.mxu0 %v2097_v17 }
 0x536   : > { %1902 = vmatprep.subr.bf16.mxu0 %v2459_v15 }
 0x539   : > { %1903 = vmatpush3.bf16.msra.mxu0 %v2098_v12 }
 0x53a   : > { %1904 = vmatprep.subr.bf16.mxu0 %v2459_v15 }
 0x53d   : > { %1905 = vmatpush3.bf16.msra.mxu0 %v2099_v18 }
 0x53e   : > { %1906 = vmatprep.subr.bf16.mxu0 %v2459_v15 }
 0x541   : > { %1907 = vmatpush3.bf16.msra.mxu0 %v2100_v54 }
 0x542   : > { %1908 = vmatprep.subr.bf16.mxu0 %v2459_v15 }
 0x545   : > { %1909 = vmatpush3.bf16.msra.mxu0 %v2101_v19 }
 0x546   : > { %1910 = vmatprep.subr.bf16.mxu0 %v2459_v15 }
 0x549   : > { %1911 = vmatpush3.bf16.msra.mxu0 %v2102_v55 }
 0x54c   : > { %1913 = vmatmul.mubr.bf16.vlgmr.msra.gmra.mrb[0].mxu0 %v1470_v22 }
 0x61f   : > { %v1576_v23 = vpop.f32.mrb[0].mxu0 }
 0x620   : > { %v1577_v24 = vadd.f32 %v1803_v56, %v1576_v23  ;;  %v1914_v9 = vpop.f32.mrb[1].mxu0 }
 0x621   : > { %v1579_v25 = vpop.f32.mrb[2].mxu0 }
 0x622   : > { %1583 = vst [vmem:[#allocation18] sm:$0xff] %v1577_v24  ;;  %v1580_v26 = vadd.f32 %v1803_v56, %v1579_v25  ;;  %v1915_v27 = vpop.f32.mrb[3].mxu0 }
 0x624   : > { %1584 = vst [vmem:[#allocation18 + $0x8] sm:$0xff] %v1580_v26 }
 0x625 PF: > { %p1964_p9 = scmp.eq.s32.totalorder %s2738_s29, 13  ;;  %s2461_s23 = smov [#allocation18]  }
 0x626   : > { %s1591_s18 = sshll.u32 %s2461_s23, 4  ;;  %s1592_s18 = int_to_ptr.vmem [resolvable:$true] %s1591_s18 }
 0x627   : > { %s2303_s17 = scalar_lea.vmem %s1592_s18, 256  ;;  %p2310_p4 = scmp.lt.s32.totalorder %s1592_s18, %s1592_s18 }
 0x628   : > { %p2304_p3 = scmp.ne.s32.totalorder %s1592_s18, %s2303_s17  ;;  %p2311_p13 = scmp.lt.s32.totalorder %s2303_s17, %s2303_s17 }
 0x62a   : > { %p2305_p0 = pnand %p2304_p3, %p1964_p9  ;;  %p2312_p8 = por %p2311_p13, %p2310_p4 }
 0x62c   : > { %p2306_p1 = pneg %p2305_p0 }
 0x62e   : > { %p2313_p11 = pnand %p2312_p8, %p2306_p1 }
 0x630   : > { %2316 = shalt.err (!%p2313_p11)
}
 0x631   : > { %s3373_s22 = sld [smem:[#allocation42_spill]] }
 0x637   : > { %s3374_s0 = smov %s3373_s22  ;;  %s2317_s19 = scalar_lea.hbm %s3373_s22, 256 }
 0x638   : > { %p2318_p6 = scmp.ne.s32.totalorder %s3374_s0, %s2317_s19  ;;  %p2323_p5 = scmp.lt.u32.totalorder %s2317_s19, %s3374_s0 }
 0x63a   : > { %p2319_p10 = pnand %p2318_p6, %p1964_p9 }
 0x63c   : > { %p2320_p2 = pneg %p2319_p10 }
 0x63e   : > { %p2325_p12 = pnand %p2323_p5, %p2320_p2 }
 0x640   : > { %2328 = shalt.err (!%p2325_p12)
}
 0x641   : > { %s2462_s8 = smov 128   ;;  %s2463_s30 = smov 8  }
 0x642   : > { %1936 = dma.vmem_to_hbm [thread:$0]  (%p1964_p9), %s1592_s18, 256, %s3374_s0, [#allocation9], %s2462_s8, %s2462_s8, %s2463_s30  }
 0x643   : > { %2396 = dma.done.wait (%p1964_p9), [#allocation9], 256  }
 0x644   : > { %2398 = vsyncadd (%p1964_p9), [#allocation9], 4294967040 }
 0x645 PF: > { %s3375_s9 = sld [smem:[#allocation32_spill]]  ;;  %s3376_s1 = sld [smem:[#allocation26_spill]] }
 0x646   : > { %s3377_s18 = sld [smem:[#allocation27_spill]]  ;;  %s3378_s19 = sld [smem:[#allocation36_spill]] }
 0x647   : > { %s3379_s20 = sld [smem:[#allocation28_spill]]  ;;  %s3380_s21 = sld [smem:[#allocation29_spill]] }
 0x648   : > { %s3381_s22 = sld [smem:[#allocation34_spill]]  ;;  %s3382_s16 = sld [smem:[#allocation33_spill]] }
 0x649   : > { %s3383_s15 = sld [smem:[#allocation35_spill]]  ;;  %s3384_s23 = smov %s2433_s25 }
 0x64a   : > { %s3385_s24 = smov %s2437_s26 }
 0x64b   : > { %s38_s27 = sadd.s32 1, %s3375_s9  }
 0x64c   : > { %p35_p7 = scmp.ge.s32.totalorder %s38_s27, 16  }
 0x64e   : > { %s3386_s25 = smov %s3382_s16  ;;  %37 = sbr.rel (!%p35_p7) target bundleno = 39 (0x27), region = 148 }
 0x64f   : > { %s3387_s26 = smov %s3383_s15 }
 0x655   :  { %1607 = vsyncpa [#allocation8], 1 }
 0x656   :  { %1609 = vsyncpa [#allocation8 + $0x1], 1 }
 0x657   :  { %1610 = vsyncpa [#allocation11], 1 }
 0x658   :  { %1612 = vsyncpa [#allocation11 + $0x1], 1 }
 0x659   :  { %1613 = vsyncpa [#allocation14], 1 }
 0x65a   :  { %1615 = vsyncpa [#allocation14 + $0x1], 1 }
 0x65b   :  { %1616 = vsyncpa [#allocation17], 1 }
 0x65c   :  { %1617 = vsyncpa [#allocation9], 1 }
 0x65d   :  { %1619 = vsyncpa [#allocation9 + $0x1], 1 }

</bundles_post_ra>
